<compile_context>
chip_gen: v7x
topology: tpu7x:2x2x1
jax: 0.10.0
libtpu: 0.0.40
codegen_flags: <defaults>
</compile_context>

<pallas_src>
import jax
import jax.numpy as jnp
from jax.experimental import pallas as pl
from jax.experimental.pallas import tpu as pltpu


def _round8(x):
    return ((x + 7) // 8) * 8


# --------------------------------------------------------------------------
# Kernel A: small-table path (in-kernel one-hot gather fused with layer 1).
# --------------------------------------------------------------------------
def _agg_gather_kernel(idx_ref, repr_ref, gu_ref, gr_ref, w2_ref, misc_ref,
                       out_ref):
    tb, d = out_ref.shape
    r = idx_ref.shape[0]                 # tb * N rows of (adjacency, rating)
    n = r // tb
    ni = gu_ref.shape[0]
    nr = gr_ref.shape[0]

    idx = idx_ref[...]                   # [R, 2] int32
    adj = idx[:, 0:1]                    # neighbor id per row
    rat = idx[:, 1:2]                    # rating id per row

    # One-hot rows (exact 0/1 in bf16) -> MXU gather.
    onehot_u = (adj == jax.lax.broadcasted_iota(jnp.int32, (r, ni), 1)
                ).astype(jnp.bfloat16)
    onehot_r = (rat == jax.lax.broadcasted_iota(jnp.int32, (r, nr), 1)
                ).astype(jnp.bfloat16)

    # Layer 1 fused with the gather:
    #   relu(E_neigh[adj] @ W1a + E_rat[rat] @ W1b + b1)
    #     == relu(onehot_u @ (E_neigh @ W1a) + onehot_r @ (E_rat @ W1b) + b1)
    h = jnp.dot(onehot_u, gu_ref[...], preferred_element_type=jnp.float32)
    h = h + jnp.dot(onehot_r, gr_ref[...], preferred_element_type=jnp.float32)
    h = jnp.maximum(h + misc_ref[0:1, :], 0.0)               # + b1, relu (f32)

    # Layer 2: cast only the MXU operand to bf16, keep elementwise in f32.
    h = jnp.dot(h.astype(jnp.bfloat16), w2_ref[...],
                preferred_element_type=jnp.float32)
    h = jnp.maximum(h + misc_ref[1:2, :], 0.0)               # + b2, relu

    # Collapsed attention tail: out = repr * (sum_n h[n] . v) + c
    hsum = jnp.sum(h.reshape(tb, n, d), axis=1)              # [tb, D]
    scale = jnp.sum(hsum * misc_ref[2:3, :], axis=-1, keepdims=True)  # [tb, 1]
    out_ref[...] = repr_ref[...] * scale + misc_ref[3:4, :]  # [tb, D]


# --------------------------------------------------------------------------
# Kernel B: large-table fallback (pre-gathered [tb*N, 2D] bf16 input).
# --------------------------------------------------------------------------
def _agg_dense_kernel(x_ref, repr_ref, w1_ref, w2_ref, misc_ref, out_ref):
    tb, d = out_ref.shape
    r = x_ref.shape[0]
    n = r // tb

    # Layer 1: single fused K = 2D matmul over cat([uv, rat], -1).
    h = jnp.dot(x_ref[...], w1_ref[...], preferred_element_type=jnp.float32)
    h = jnp.maximum(h + misc_ref[0:1, :], 0.0)

    # Layer 2.
    h = jnp.dot(h.astype(jnp.bfloat16), w2_ref[...],
                preferred_element_type=jnp.float32)
    h = jnp.maximum(h + misc_ref[1:2, :], 0.0)

    # Collapsed attention tail.
    hsum = jnp.sum(h.reshape(tb, n, d), axis=1)
    scale = jnp.sum(hsum * misc_ref[2:3, :], axis=-1, keepdims=True)
    out_ref[...] = repr_ref[...] * scale + misc_ref[3:4, :]


# --------------------------------------------------------------------------
# Wrapper
# --------------------------------------------------------------------------
def user_item_aggregate(nodes, uv_adjacency, ratings,
                        user_emb, item_emb, rating_emb,
                        params, user_latent_flag=True, tb=256,
                        max_fused_table_rows=512):
    w1, b1, w2, b2, wa2, ba2, wa3, ba3 = params
    D = user_emb.shape[1]
    B, N = uv_adjacency.shape

    if user_latent_flag:
        neigh_emb, node_emb = item_emb, user_emb
    else:
        neigh_emb, node_emb = user_emb, item_emb

    # Node "repr" rows are tiny ([B, D]); gather in JAX, keep f32 for the AXPY.
    reprs = node_emb[nodes].astype(jnp.float32)

    # ---- weight prep: [in, out] layouts + collapsed attention tail ---------
    w1t = jnp.transpose(w1).astype(jnp.float32)            # [2D, D]
    w2t = jnp.transpose(w2).astype(jnp.bfloat16)            # [D, D]
    v = (jnp.transpose(wa2) @ jnp.transpose(wa3)).reshape(D)        # Wa2^T Wa3^T
    c = (ba2 @ jnp.transpose(wa3) + ba3).reshape(())                 # scalar
    misc = jnp.zeros((8, D), jnp.float32)
    misc = misc.at[0, :].set(b1.astype(jnp.float32))
    misc = misc.at[1, :].set(b2.astype(jnp.float32))
    misc = misc.at[2, :].set(v.astype(jnp.float32))
    misc = misc.at[3, :].set(c.astype(jnp.float32))          # broadcast row

    # ---- node tile: big tiles, even number of >=2 steps for v7x megacore ---
    tb = max(8, _round8(min(tb, B)))
    steps = pl.cdiv(B, tb)
    if steps == 1 and B > 8:
        tb = max(8, _round8(pl.cdiv(B, 2)))                  # 2 steps -> 2 TCs
    elif steps > 1 and steps % 2 == 1:
        tb = max(8, _round8(pl.cdiv(B, steps + 1)))          # even step count
    steps = pl.cdiv(B, tb)
    b_pad = steps * tb
    if b_pad != B:
        reprs = jnp.pad(reprs, ((0, b_pad - B), (0, 0)))

    repr_spec = pl.BlockSpec((tb, D), lambda i: (i, 0))
    out_spec = pl.BlockSpec((tb, D), lambda i: (i, 0))
    w2_spec = pl.BlockSpec((D, D), lambda i: (0, 0))
    misc_spec = pl.BlockSpec((8, D), lambda i: (0, 0))

    n_tab = max(neigh_emb.shape[0], rating_emb.shape[0])
    if n_tab <= max_fused_table_rows:
        # ---- small-table path: stream indices, gather + W1 inside kernel ---
        ni = _round8(neigh_emb.shape[0])
        nr = _round8(rating_emb.shape[0])
        neigh_p = jnp.pad(neigh_emb.astype(jnp.float32),
                          ((0, ni - neigh_emb.shape[0]), (0, 0)))
        rat_p = jnp.pad(rating_emb.astype(jnp.float32),
                        ((0, nr - rating_emb.shape[0]), (0, 0)))
        g_uv = (neigh_p @ w1t[:D]).astype(jnp.bfloat16)      # E_neigh @ W1a
        g_rat = (rat_p @ w1t[D:]).astype(jnp.bfloat16)       # E_rating @ W1b

        idx = jnp.stack([uv_adjacency.astype(jnp.int32),
                         ratings.astype(jnp.int32)], axis=-1).reshape(B * N, 2)
        if b_pad != B:
            idx = jnp.pad(idx, ((0, (b_pad - B) * N), (0, 0)))

        # VMEM budget: double-buffered blocks + single-buffered temporaries.
        est = 2 * (tb * N * 128 * 4                 # idx block (lane-padded)
                   + 2 * tb * D * 4                 # reprs + out blocks
                   + (ni + nr + D) * D * 2 + 8 * D * 4)
        est += tb * N * (8 * D + 8 * max(ni, nr))   # h / one-hot / iota temps

        grid_spec = pltpu.PrefetchScalarGridSpec(
            num_scalar_prefetch=0,
            grid=(steps,),
            in_specs=[
                pl.BlockSpec((tb * N, 2), lambda i: (i, 0)),   # (adj, rating)
                repr_spec,
                pl.BlockSpec((ni, D), lambda i: (0, 0)),       # E_neigh @ W1a
                pl.BlockSpec((nr, D), lambda i: (0, 0)),       # E_rating @ W1b
                w2_spec, misc_spec,
            ],
            out_specs=out_spec,
        )
        out = pl.pallas_call(
            _agg_gather_kernel,
            grid_spec=grid_spec,
            out_shape=jax.ShapeDtypeStruct((b_pad, D), jnp.float32),
            compiler_params=pltpu.CompilerParams(
                dimension_semantics=("parallel",),
                vmem_limit_bytes=int(min(96 * 2**20, max(32 * 2**20, 2 * est)))),
        )(idx, reprs, g_uv, g_rat, w2t, misc)
    else:
        # ---- large-table fallback: JAX gather, fused K=2D layer-1 ----------
        # TODO(synk): tables too large for VMEM residency; the data-dependent
        # embedding gather stays in XLA outside the kernel.
        x = jnp.concatenate([neigh_emb[uv_adjacency], rating_emb[ratings]],
                            axis=-1).reshape(B * N, 2 * D).astype(jnp.bfloat16)
        if b_pad != B:
            x = jnp.pad(x, ((0, (b_pad - B) * N), (0, 0)))
        w1_bf = w1t.astype(jnp.bfloat16)

        est = 2 * (tb * N * 2 * D * 2 + 2 * tb * D * 4
                   + 3 * D * D * 2 + 8 * D * 4)
        est += tb * N * 8 * D

        grid_spec = pltpu.PrefetchScalarGridSpec(
            num_scalar_prefetch=0,
            grid=(steps,),
            in_specs=[
                pl.BlockSpec((tb * N, 2 * D), lambda i: (i, 0)),  # cat([uv,rat])
                repr_spec,
                pl.BlockSpec((2 * D, D), lambda i: (0, 0)),       # W1^T
                w2_spec, misc_spec,
            ],
            out_specs=out_spec,
        )
        out = pl.pallas_call(
            _agg_dense_kernel,
            grid_spec=grid_spec,
            out_shape=jax.ShapeDtypeStruct((b_pad, D), jnp.float32),
            compiler_params=pltpu.CompilerParams(
                dimension_semantics=("parallel",),
                vmem_limit_bytes=int(min(96 * 2**20, max(32 * 2**20, 2 * est)))),
        )(x, reprs, w1_bf, w2t, misc)

    return out[:B]                                  # aggregated_matrix: [B, D]


# --------------------------------------------------------------------------
# Plain-JAX transcription of the PyTorch forward, for checking.
# --------------------------------------------------------------------------
def reference(nodes, adj, ratings, user_emb, item_emb, rating_emb,
              params, user_latent_flag=True):
    w1, b1, w2, b2, wa2, ba2, wa3, ba3 = params
    outs = []
    for i in range(adj.shape[0]):
        if user_latent_flag:
            uv = item_emb[adj[i]]
            r = user_emb[nodes[i]]
        else:
            uv = user_emb[adj[i]]
            r = item_emb[nodes[i]]
        re = rating_emb[ratings[i]]
        x = jnp.concatenate([uv, re], axis=1)
        h = jax.nn.relu(x @ w1.T + b1)
        h = jax.nn.relu(h @ w2.T + b2)
        rep = jnp.tile(r[None, :], (adj.shape[1], 1))
        att = (h.T @ rep).T
        u = att @ wa2.T + ba2
        u = u @ wa3.T + ba3
        outs.append(u[:, 0])
    return jnp.stack(outs)


if __name__ == "__main__":
    key = jax.random.PRNGKey(0)
    D, N, B = 128, 16, 32
    n_users, n_items, n_ratings = 40, 48, 5
    ks = jax.random.split(key, 14)

    user_emb = 0.1 * jax.random.normal(ks[0], (n_users, D), jnp.float32)
    item_emb = 0.1 * jax.random.normal(ks[1], (n_items, D), jnp.float32)
    rating_emb = 0.1 * jax.random.normal(ks[2], (n_ratings, D), jnp.float32)

    w1 = jax.random.normal(ks[3], (D, 2 * D), jnp.float32) / (2 * D) ** 0.5
    b1 = 0.01 * jax.random.normal(ks[4], (D,), jnp.float32)
    w2 = jax.random.normal(ks[5], (D, D), jnp.float32) / D ** 0.5
    b2 = 0.01 * jax.random.normal(ks[6], (D,), jnp.float32)
    wa2 = jax.random.normal(ks[7], (D, D), jnp.float32) / D ** 0.5
    ba2 = 0.01 * jax.random.normal(ks[8], (D,), jnp.float32)
    wa3 = jax.random.normal(ks[9], (1, D), jnp.float32) / D ** 0.5
    ba3 = 0.01 * jax.random.normal(ks[10], (1,), jnp.float32)
    params = (w1, b1, w2, b2, wa2, ba2, wa3, ba3)

    nodes = jax.random.randint(ks[11], (B,), 0, n_users, dtype=jnp.int32)
    adj = jax.random.randint(ks[12], (B, N), 0, n_items, dtype=jnp.int32)
    ratings = jax.random.randint(ks[13], (B, N), 0, n_ratings, dtype=jnp.int32)

    ref = reference(nodes, adj, ratings, user_emb, item_emb, rating_emb,
                    params, user_latent_flag=True)

    # Path 1: small-table fast path (in-kernel one-hot gather fused with W1).
    out = user_item_aggregate(nodes, adj, ratings,
                              user_emb, item_emb, rating_emb,
                              params, user_latent_flag=True, tb=256)
    jax.block_until_ready(out)
    assert out.shape == (B, D), out.shape
    assert bool(jnp.all(jnp.isfinite(out)))
    assert bool(jnp.allclose(out, ref, rtol=5e-2, atol=5e-2)), "gather path mismatch"

    # Path 2: large-table fallback (forced), same math via JAX-side gather.
    out2 = user_item_aggregate(nodes, adj, ratings,
                               user_emb, item_emb, rating_emb,
                               params, user_latent_flag=True, tb=256,
                               max_fused_table_rows=0)
    jax.block_until_ready(out2)
    assert bool(jnp.allclose(out2, ref, rtol=5e-2, atol=5e-2)), "dense path mismatch"

    print("KERNEL_OK")
</pallas_src>

<mosaic_0001>
module attributes {stable_mosaic.version = 11 : i64} {
  func.func @_agg_gather_kernel(%arg0: i32, %arg1: memref<256x2xi32, #tpu.memory_space<vmem>>, %arg2: memref<16x128xf32, #tpu.memory_space<vmem>>, %arg3: memref<48x128xbf16, #tpu.memory_space<vmem>>, %arg4: memref<8x128xbf16, #tpu.memory_space<vmem>>, %arg5: memref<128x128xbf16, #tpu.memory_space<vmem>>, %arg6: memref<8x128xf32, #tpu.memory_space<vmem>>, %arg7: memref<16x128xf32, #tpu.memory_space<vmem>>) attributes {dimension_semantics = [#tpu.dimension_semantics<parallel>], iteration_bounds = array<i64: 2>, scalar_prefetch = 0 : i64, scratch_operands = 0 : i64, tpu.core_type = #tpu.core_type<tc>, window_params = [{transform_indices = @transform_0, window_bounds = array<i64: 256, 2>}, {transform_indices = @transform_1, window_bounds = array<i64: 16, 128>}, {pipeline_mode = #tpu.pipeline_mode<synchronous>, transform_indices = @transform_2, window_bounds = array<i64: 48, 128>}, {pipeline_mode = #tpu.pipeline_mode<synchronous>, transform_indices = @transform_3, window_bounds = array<i64: 8, 128>}, {pipeline_mode = #tpu.pipeline_mode<synchronous>, transform_indices = @transform_4, window_bounds = array<i64: 128, 128>}, {pipeline_mode = #tpu.pipeline_mode<synchronous>, transform_indices = @transform_5, window_bounds = array<i64: 8, 128>}, {transform_indices = @transform_6, window_bounds = array<i64: 16, 128>}]} {
    %c0 = arith.constant 0 : index
    %c0_0 = arith.constant 0 : index
    %0 = vector.load %arg1[%c0, %c0_0] : memref<256x2xi32, #tpu.memory_space<vmem>>, vector<256x2xi32>
    %1 = vector.extract_strided_slice %0 {offsets = [0, 0], sizes = [256, 1], strides = [1, 1]} : vector<256x2xi32> to vector<256x1xi32>
    %2 = vector.extract_strided_slice %0 {offsets = [0, 1], sizes = [256, 1], strides = [1, 1]} : vector<256x2xi32> to vector<256x1xi32>
    %3 = tpu.iota {dimensions = array<i32: 1>} : vector<256x48xi32>
    %4 = vector.broadcast %1 : vector<256x1xi32> to vector<256x48xi32>
    %5 = arith.cmpi eq, %4, %3 : vector<256x48xi32>
    %6 = arith.extui %5 : vector<256x48xi1> to vector<256x48xi32>
    %7 = arith.sitofp %6 : vector<256x48xi32> to vector<256x48xf32>
    %8 = arith.truncf %7 : vector<256x48xf32> to vector<256x48xbf16>
    %9 = tpu.iota {dimensions = array<i32: 1>} : vector<256x8xi32>
    %10 = vector.broadcast %2 : vector<256x1xi32> to vector<256x8xi32>
    %11 = arith.cmpi eq, %10, %9 : vector<256x8xi32>
    %12 = arith.extui %11 : vector<256x8xi1> to vector<256x8xi32>
    %13 = arith.sitofp %12 : vector<256x8xi32> to vector<256x8xf32>
    %14 = arith.truncf %13 : vector<256x8xf32> to vector<256x8xbf16>
    %c0_1 = arith.constant 0 : index
    %c0_2 = arith.constant 0 : index
    %15 = vector.load %arg3[%c0_1, %c0_2] : memref<48x128xbf16, #tpu.memory_space<vmem>>, vector<48x128xbf16>
    %cst = arith.constant dense<0.000000e+00> : vector<256x128xf32>
    %16 = tpu.matmul %8, %15, %cst {dimension_numbers = #tpu.dot_dimension_numbers<[1], [0], [0], [1], [0, 0, 1, 1], [], []>} : vector<256x48xbf16>, vector<48x128xbf16>, vector<256x128xf32> -> vector<256x128xf32>
    %c0_3 = arith.constant 0 : index
    %c0_4 = arith.constant 0 : index
    %17 = vector.load %arg4[%c0_3, %c0_4] : memref<8x128xbf16, #tpu.memory_space<vmem>>, vector<8x128xbf16>
    %cst_5 = arith.constant dense<0.000000e+00> : vector<256x128xf32>
    %18 = tpu.matmul %14, %17, %cst_5 {dimension_numbers = #tpu.dot_dimension_numbers<[1], [0], [0], [1], [0, 0, 1, 1], [], []>} : vector<256x8xbf16>, vector<8x128xbf16>, vector<256x128xf32> -> vector<256x128xf32>
    %19 = arith.addf %16, %18 : vector<256x128xf32>
    %c0_6 = arith.constant 0 : index
    %c0_7 = arith.constant 0 : index
    %20 = vector.load %arg6[%c0_6, %c0_7] : memref<8x128xf32, #tpu.memory_space<vmem>>, vector<1x128xf32>
    %21 = vector.broadcast %20 : vector<1x128xf32> to vector<256x128xf32>
    %22 = arith.addf %19, %21 : vector<256x128xf32>
    %cst_8 = arith.constant 0.000000e+00 : f32
    %23 = vector.broadcast %cst_8 : f32 to vector<256x128xf32>
    %24 = arith.maximumf %22, %23 : vector<256x128xf32>
    %25 = arith.truncf %24 : vector<256x128xf32> to vector<256x128xbf16>
    %c0_9 = arith.constant 0 : index
    %c0_10 = arith.constant 0 : index
    %26 = vector.load %arg5[%c0_9, %c0_10] : memref<128x128xbf16, #tpu.memory_space<vmem>>, vector<128x128xbf16>
    %cst_11 = arith.constant dense<0.000000e+00> : vector<256x128xf32>
    %27 = tpu.matmul %25, %26, %cst_11 {dimension_numbers = #tpu.dot_dimension_numbers<[1], [0], [0], [1], [0, 0, 1, 1], [], []>} : vector<256x128xbf16>, vector<128x128xbf16>, vector<256x128xf32> -> vector<256x128xf32>
    %c1 = arith.constant 1 : index
    %c0_12 = arith.constant 0 : index
    %28 = vector.load %arg6[%c1, %c0_12] : memref<8x128xf32, #tpu.memory_space<vmem>>, vector<1x128xf32>
    %29 = vector.broadcast %28 : vector<1x128xf32> to vector<256x128xf32>
    %30 = arith.addf %27, %29 : vector<256x128xf32>
    %cst_13 = arith.constant 0.000000e+00 : f32
    %31 = vector.broadcast %cst_13 : f32 to vector<256x128xf32>
    %32 = arith.maximumf %30, %31 : vector<256x128xf32>
    %33 = vector.shape_cast %32 : vector<256x128xf32> to vector<16x16x128xf32>
    %cst_14 = arith.constant dense<0.000000e+00> : vector<16x128xf32>
    %34 = vector.multi_reduction <add>, %33, %cst_14 [1] : vector<16x16x128xf32> to vector<16x128xf32>
    %c2 = arith.constant 2 : index
    %c0_15 = arith.constant 0 : index
    %35 = vector.load %arg6[%c2, %c0_15] : memref<8x128xf32, #tpu.memory_space<vmem>>, vector<1x128xf32>
    %36 = vector.broadcast %35 : vector<1x128xf32> to vector<16x128xf32>
    %37 = arith.mulf %34, %36 : vector<16x128xf32>
    %cst_16 = arith.constant dense<0.000000e+00> : vector<16xf32>
    %38 = vector.multi_reduction <add>, %37, %cst_16 [1] : vector<16x128xf32> to vector<16xf32>
    %39 = vector.shape_cast %38 : vector<16xf32> to vector<16x1xf32>
    %c0_17 = arith.constant 0 : index
    %c0_18 = arith.constant 0 : index
    %40 = vector.load %arg2[%c0_17, %c0_18] : memref<16x128xf32, #tpu.memory_space<vmem>>, vector<16x128xf32>
    %41 = vector.broadcast %39 : vector<16x1xf32> to vector<16x128xf32>
    %42 = arith.mulf %40, %41 : vector<16x128xf32>
    %c3 = arith.constant 3 : index
    %c0_19 = arith.constant 0 : index
    %43 = vector.load %arg6[%c3, %c0_19] : memref<8x128xf32, #tpu.memory_space<vmem>>, vector<1x128xf32>
    %44 = vector.broadcast %43 : vector<1x128xf32> to vector<16x128xf32>
    %45 = arith.addf %42, %44 : vector<16x128xf32>
    %c0_20 = arith.constant 0 : index
    %c0_21 = arith.constant 0 : index
    %46 = vector.load %arg7[%c0_20, %c0_21] : memref<16x128xf32, #tpu.memory_space<vmem>>, vector<16x128xf32>
    tpu.vector_store %arg7[%c0_20, %c0_21], %45 {strides = array<i32>} : memref<16x128xf32, #tpu.memory_space<vmem>>, vector<16x128xf32>,
    return
  }
  func.func @transform_0(%arg0: i32) -> (i32, i32) {
    %c0_i32 = arith.constant 0 : i32
    %c0_i32_0 = arith.constant 0 : i32
    return %arg0, %c0_i32 : i32, i32
  }
  func.func @transform_1(%arg0: i32) -> (i32, i32) {
    %c0_i32 = arith.constant 0 : i32
    %c0_i32_0 = arith.constant 0 : i32
    return %arg0, %c0_i32 : i32, i32
  }
  func.func @transform_2(%arg0: i32) -> (i32, i32) {
    %c0_i32 = arith.constant 0 : i32
    %c0_i32_0 = arith.constant 0 : i32
    %c0_i32_1 = arith.constant 0 : i32
    return %c0_i32, %c0_i32_0 : i32, i32
  }
  func.func @transform_3(%arg0: i32) -> (i32, i32) {
    %c0_i32 = arith.constant 0 : i32
    %c0_i32_0 = arith.constant 0 : i32
    %c0_i32_1 = arith.constant 0 : i32
    return %c0_i32, %c0_i32_0 : i32, i32
  }
  func.func @transform_4(%arg0: i32) -> (i32, i32) {
    %c0_i32 = arith.constant 0 : i32
    %c0_i32_0 = arith.constant 0 : i32
    %c0_i32_1 = arith.constant 0 : i32
    return %c0_i32, %c0_i32_0 : i32, i32
  }
  func.func @transform_5(%arg0: i32) -> (i32, i32) {
    %c0_i32 = arith.constant 0 : i32
    %c0_i32_0 = arith.constant 0 : i32
    %c0_i32_1 = arith.constant 0 : i32
    return %c0_i32, %c0_i32_0 : i32, i32
  }
  func.func @transform_6(%arg0: i32) -> (i32, i32) {
    %c0_i32 = arith.constant 0 : i32
    %c0_i32_0 = arith.constant 0 : i32
    return %arg0, %c0_i32 : i32, i32
  }
}

</mosaic_0001>

<bundles_post_ra>
// kernel: tpu_custom_call.1
= control target key start
LH: loop header
LB: loop body
LE: loop exit
PB: predicated region body
PF: predicated region fallthrough
CT: control target
= control target key end

     0   :  { %11 = vsyncpa [#allocation3], 0  ;;  %s2827_s0 = inlined_call_operand.vmem [shape: s32[512,2], index: 0, kind: input, shape index: {}]   ;;  %s2828_s1 = inlined_call_operand.vmem [shape: f32[32,128], index: 1, kind: input, shape index: {}]   ;;  %s2829_s2 = inlined_call_operand.vmem [shape: bf16[48,128], index: 2, kind: input, shape index: {}]   ;;  %s2830_s3 = inlined_call_operand.vmem [shape: bf16[8,128], index: 3, kind: input, shape index: {}]   ;;  %s2831_s4 = inlined_call_operand.vmem [shape: bf16[128,128], index: 4, kind: input, shape index: {}]   ;;  %s2832_s5 = inlined_call_operand.vmem [shape: f32[8,128], index: 5, kind: input, shape index: {}]   ;;  %s2833_s6 = inlined_call_operand.hbm [shape: f32[32,128], index: 6, kind: output, shape index: {}]  }
   0x1   :  { %13 = vsyncpa [#allocation3 + $0x1], 0  ;;  %s2335_s21 = smov 0   ;;  %s2337_s22 = smov 0  }
   0x2   :  { %s2339_s23 = smov 0   ;;  %s2341_s24 = smov 0  }
   0x3 LB: > { %s2356_s25 = sadd.s32 4294967295, %s2292_s24   ;;  %s1813_s26 = sadd.s32 4294967294, %s2292_s24   ;;  %s2292_s24 = sphi %s2341_s24, %s2839_s24   ;;  %s2288_s23 = sphi %s2339_s23, %s2838_s23   ;;  %s2284_s22 = sphi %s2337_s22, %s2837_s22   ;;  %s2280_s21 = sphi %s2335_s21, %s2836_s21  }
   0x4   : > { %s2360_s27 = sadd.s32 1, %s2292_s24   ;;  %s162_s28 = sadd.s32 1, %s2288_s23 }
   0x5   : > { %s159_s29 = ssub.s32 %s2292_s24, %s2360_s27  ;;  %p172_p0 = scmp.ne.s32.totalorder %s2288_s23, %s2284_s22 }
   0x6   : > { %p160_p1 = scmp.eq.s32.totalorder %s159_s29, 0  ;;  %p173_p2 = scmp.eq.s32.totalorder %s2356_s25, 1 }
   0x7   : > { %p178_p3 = scmp.ne.s32.totalorder %s2284_s22, %s2280_s21  ;;  %p179_p4 = scmp.eq.s32.totalorder %s1813_s26, 1 }
   0x8   : > { %s2371_s30 = scalar_select %p160_p1, %s2288_s23, %s162_s28  }
   0x9   : > { %p2373_p5 = por %p173_p2, %p172_p0  ;;  %p2377_p6 = por %p179_p4, %p178_p3 }
   0xa   : > { %p1816_p7 = scmp.ge.s32.totalorder %s2292_s24, 1  ;;  %p227_p8 = scmp.lt.s32.totalorder %s2292_s24, 3 }
   0xc   : > { %p228_p9 = pnand %p1816_p7, %p227_p8 }
   0xd   : > { %s1818_s9 = sshll.u32 (!%p228_p9), %s2356_s25, 5  ;;  %v2294_v0 = vmov (!%p228_p9), 1   ;;  %vm782_vm0 = vcmask (!%p228_p9), 1043456   ;;  %v732_v9 = vld [vmem:[%s2830_s3] sm:$0xf] (!%p228_p9)  ;;  %v2295_v20 = vmov (!%p228_p9), 0   ;;  %v308_v35 = vlaneseq (!%p228_p9) }
   0xe   : > { %231 = sbr.rel (%p228_p9) target bundleno = 937 (0x3a9), region = 44  ;;  %2200 = vset.pattern.permute.xlu1 (!%p228_p9), %v2294_v0  ;;  %2199 = vset.pattern.permute.xlu0 (!%p228_p9), %v2294_v0  ;;  %p263_p10 = scmp.lt.s32.totalorder (!%p228_p9), %s1818_s9, 63  ;;  %v784_v10 = vsel (!%p228_p9), %vm782_vm0, %v732_v9, 0  ;;  %v2413_v19 = vld [vmem:[%s2829_s2] sm:$0xff] (!%p228_p9)   ;;  %v2296_v40 = vmov (!%p228_p9), 0.0   ;;  %vm733_vm5 = vcmask (!%p228_p9), 64512  }
   0xf   : > { %2153 = vmatprep.subr.msk.bf16.mxu0 (!%p228_p9), %vm782_vm0, %v732_v9  ;;  %2154 = vmatprep.subr.msk.bf16.mxu1 (!%p228_p9), %vm782_vm0, %v732_v9  ;;  %v2450_v37 = vand.u32 (!%p228_p9), 127, %v308_v35  ;;  %v2220_v51 = vld [vmem:[%s2829_s2 + $0x8] sm:$0xff] (!%p228_p9)   ;;  %v2221_v57 = vld [vmem:[%s2829_s2 + $0x10] sm:$0xff] (!%p228_p9)   ;;  %s1820_s14 = sshll.u32 (!%p228_p9), %s2356_s25, 1  ;;  %s259_s19 = sand.u32 (!%p228_p9), 1, %s2284_s22  }
  0x10   : > { %2000 = vmatpush3.bf16.msra.mxu0 (!%p228_p9), %v784_v10  ;;  %2120 = vmatpush3.bf16.msra.mxu1 (!%p228_p9), %v784_v10  ;;  %p269_p11 = scmp.lt.s32.totalorder (!%p228_p9), %s1820_s14, 3  ;;  %s1817_s20 = sshll.u32 (!%p228_p9), %s259_s19, 4 }
  0x11   : > { %2033 = vmatprep.subr.bf16.mxu0 (!%p228_p9), %v2413_v19  ;;  %s261_s29 = scalar_lea.vmem (!%p228_p9), [#allocation2], %s1817_s20 }
  0x15   : > { %s2841_s9 = smov (!%p263_p10, %s1818_s9), 63  ;;  %s2843_s14 = smov (!%p269_p11, %s1820_s14), 3 }
  0x16   : > { %s1819_s10 = sshll.u32 %s2841_s9, 3  ;;  %s1821_s15 = sshll.u32 %s2843_s14, 3 }
  0x17   : > { %s2389_s13 = scalar_lea.vmem %s2827_s0, %s1819_s10  ;;  %s272_s18 = scalar_lea.vmem %s2828_s1, %s1821_s15 }
  0x18   : > { %v278_v1 = vld [vmem:[%s2389_s13 + $0x10] sm:$0xff]  ;;  %v276_v2 = vld [vmem:[%s2389_s13] sm:$0xff]  ;;  %v279_v3 = vld [vmem:[%s2389_s13 + $0x18] sm:$0xff]  ;;  %s1739_s9 = sshll.u32 %s261_s29, 4  ;;  %s1938_s10 = sshll.u32 %s2356_s25, 8  ;;  %s2779_s9 = int_to_ptr.vmem [resolvable:$true] %s1739_s9 }
  0x19   : > { %525 = vperm.xlu1 %2200, %v278_v1   ;;  %519 = vperm.xlu0 %2199, %v276_v2   ;;  %v277_v4 = vld [vmem:[%s2389_s13 + $0x8] sm:$0xff]  ;;  %v280_v6 = vld [vmem:[%s2389_s13 + $0x20] sm:$0xff]  ;;  %v283_v7 = vld [vmem:[%s2389_s13 + $0x38] sm:$0xff]  ;;  %s2786_s14 = scalar_lea.sflag [#allocation3], %s259_s19  ;;  %s2230_s15 = scalar_lea.vmem %s2779_s9, 256 }
  0x1a   : > { %v281_v5 = vld [vmem:[%s2389_s13 + $0x28] sm:$0xff]  ;;  %v282_v8 = vld [vmem:[%s2389_s13 + $0x30] sm:$0xff]  ;;  %v284_v12 = vld [vmem:[%s2389_s13 + $0x40] sm:$0xff]  ;;  %p2231_p12 = scmp.ne.s32.totalorder %s2779_s9, %s2230_s15  ;;  %s2297_s25 = smov [#allocation2]  }
  0x1b   : > { %v285_v11 = vld [vmem:[%s2389_s13 + $0x48] sm:$0xff]  ;;  %v287_v13 = vld [vmem:[%s2389_s13 + $0x58] sm:$0xff]  ;;  %v286_v14 = vld [vmem:[%s2389_s13 + $0x50] sm:$0xff]  ;;  %s2234_s16 = sshll.u32 %s2297_s25, 4  ;;  %s2235_s16 = int_to_ptr.vmem [resolvable:$false] %s2234_s16 }
  0x1c   : > { %v289_v15 = vld [vmem:[%s2389_s13 + $0x68] sm:$0xff]  ;;  %v288_v16 = vld [vmem:[%s2389_s13 + $0x60] sm:$0xff]  ;;  %v291_v17 = vld [vmem:[%s2389_s13 + $0x78] sm:$0xff]  ;;  %p2232_p13 = pnand %p2231_p12, %p2373_p5  ;;  %s2236_s17 = scalar_lea.vmem %s2235_s16, 512 }
  0x1d   : > { %528 = vperm.xlu1 %2200, %v279_v3   ;;  %522 = vperm.xlu0 %2199, %v277_v4   ;;  %v290_v18 = vld [vmem:[%s2389_s13 + $0x70] sm:$0xff]  ;;  %v292_v21 = vld [vmem:[%s2389_s13 + $0x80] sm:$0xff]  ;;  %v293_v22 = vld [vmem:[%s2389_s13 + $0x88] sm:$0xff]  ;;  %p2237_p1 = scmp.lt.s32.totalorder %s2779_s9, %s2235_s16  ;;  %p2238_p2 = scmp.lt.s32.totalorder %s2236_s17, %s2230_s15 }
  0x1e   : > { %v296_v23 = vld [vmem:[%s2389_s13 + $0xa0] sm:$0xff]  ;;  %v294_v25 = vld [vmem:[%s2389_s13 + $0x90] sm:$0xff]  ;;  %v295_v27 = vld [vmem:[%s2389_s13 + $0x98] sm:$0xff]  ;;  %p2233_p0 = pneg %p2232_p13 }
  0x1f   : > { %v300_v24 = vld [vmem:[%s2389_s13 + $0xc0] sm:$0xff]  ;;  %v297_v28 = vld [vmem:[%s2389_s13 + $0xa8] sm:$0xff]  ;;  %v298_v29 = vld [vmem:[%s2389_s13 + $0xb0] sm:$0xff]  ;;  %p2239_p3 = por %p2238_p2, %p2237_p1 }
  0x20   : > { %v2426_v26 = vld [vmem:[%s2389_s13 + $0xe0] sm:$0xff]  ;;  %v301_v30 = vld [vmem:[%s2389_s13 + $0xc8] sm:$0xff]  ;;  %v302_v31 = vld [vmem:[%s2389_s13 + $0xd0] sm:$0xff] }
  0x21   : > { %534 = vperm.xlu1 %2200, %v281_v5   ;;  %531 = vperm.xlu0 %2199, %v280_v6   ;;  %v299_v32 = vld [vmem:[%s2389_s13 + $0xb8] sm:$0xff]  ;;  %v305_v33 = vld [vmem:[%s2389_s13 + $0xe8] sm:$0xff]  ;;  %v2443_v34 = vld [vmem:[%s2389_s13 + $0xf0] sm:$0xff]  ;;  %p2240_p4 = pnand %p2239_p3, %p2233_p0 }
  0x22   : > { %v303_v36 = vld [vmem:[%s2389_s13 + $0xd8] sm:$0xff] }
  0x25   : > { %540 = vperm.xlu1 %2200, %v283_v7   ;;  %537 = vperm.xlu0 %2199, %v282_v8  }
  0x29   : > { %546 = vperm.xlu1 %2200, %v285_v11   ;;  %543 = vperm.xlu0 %2199, %v284_v12  }
  0x2d   : > { %552 = vperm.xlu1 %2200, %v287_v13   ;;  %549 = vperm.xlu0 %2199, %v286_v14  }
  0x31   : > { %558 = vperm.xlu1 %2200, %v289_v15   ;;  %555 = vperm.xlu0 %2199, %v288_v16  }
  0x35   : > { %564 = vperm.xlu1 %2200, %v291_v17   ;;  %561 = vperm.xlu0 %2199, %v290_v18  }
  0x39   : > { %2202 = vset.pattern.permute.xlu1 %v2295_v20  ;;  %2201 = vset.pattern.permute.xlu0 %v2295_v20 }
  0x3a   : > { %314 = vperm.xlu1 %2202, %v277_v4   ;;  %311 = vperm.xlu0 %2201, %v276_v2  }
  0x3e   : > { %317 = vperm.xlu1 %2202, %v278_v1   ;;  %320 = vperm.xlu0 %2201, %v279_v3  }
  0x42   : > { %323 = vperm.xlu1 %2202, %v280_v6   ;;  %326 = vperm.xlu0 %2201, %v281_v5   ;;  %v307_v5 = vld [vmem:[%s2389_s13 + $0xf8] sm:$0xff]  ;;  %s2784_s13 = scalar_lea.hbm %s2833_s6, %s1938_s10 }
  0x46   : > { %329 = vperm.xlu1 %2202, %v282_v8   ;;  %332 = vperm.xlu0 %2201, %v283_v7  }
  0x4a   : > { %335 = vperm.xlu1 %2202, %v284_v12   ;;  %338 = vperm.xlu0 %2201, %v285_v11  }
  0x4e   : > { %341 = vperm.xlu1 %2202, %v286_v14   ;;  %344 = vperm.xlu0 %2201, %v287_v13  }
  0x52   : > { %347 = vperm.xlu1 %2202, %v288_v16   ;;  %350 = vperm.xlu0 %2201, %v289_v15  }
  0x56   : > { %353 = vperm.xlu1 %2202, %v290_v18   ;;  %356 = vperm.xlu0 %2201, %v291_v17  }
  0x5a   : > { %359 = vperm.xlu1 %2202, %v292_v21   ;;  %362 = vperm.xlu0 %2201, %v293_v22  }
  0x5e   : > { %2203 = vset.pattern.permute.xlu1 %v2294_v0  ;;  %371 = vperm.xlu0 %2201, %v296_v23  }
  0x5f   : > { %567 = vperm.xlu1 %2203, %v292_v21   ;;  %v2509_v21 = vld [vmem:[%s2831_s4] sm:$0xff]  }
  0x60   : > { %2071 = vmatprep.subr.bf16.mxu1 %v2509_v21 }
  0x62   : > { %383 = vperm.xlu0 %2201, %v300_v24  }
  0x63   : > { %2204 = vset.pattern.permute.xlu1 %v2295_v20 }
  0x64   : > { %365 = vperm.xlu1 %2204, %v294_v25  }
  0x66   : > { %395 = vperm.xlu0 %2201, %v2426_v26  }
  0x68   : > { %368 = vperm.xlu1 %2204, %v295_v27  }
  0x6a   : > { %2214 = vset.pattern.permute.xlu0 %v2294_v0 }
  0x6b   : > { %570 = vperm.xlu0 %2214, %v293_v22  }
  0x6c   : > { %2205 = vset.pattern.permute.xlu1 %v2294_v0 }
  0x6d   : > { %576 = vperm.xlu1 %2205, %v295_v27  }
  0x6f   : > { %573 = vperm.xlu0 %2214, %v294_v25  }
  0x71   : > { %2206 = vset.pattern.permute.xlu1 %v2295_v20 }
  0x72   : > { %374 = vperm.xlu1 %2206, %v297_v28  }
  0x73   : > { %582 = vperm.xlu0 %2214, %v297_v28  }
  0x76   : > { %2207 = vset.pattern.permute.xlu1 %v2294_v0 }
  0x77   : > { %579 = vperm.xlu1 %2207, %v296_v23   ;;  %585 = vperm.xlu0 %2214, %v298_v29  }
  0x7b   : > { %2208 = vset.pattern.permute.xlu1 %v2295_v20  ;;  %594 = vperm.xlu0 %2214, %v301_v30  }
  0x7c   : > { %377 = vperm.xlu1 %2208, %v298_v29  }
  0x7f   : > { %597 = vperm.xlu0 %2214, %v302_v31  }
  0x80   : > { %380 = vperm.xlu1 %2208, %v299_v32  }
  0x83   : > { %606 = vperm.xlu0 %2214, %v305_v33  }
  0x84   : > { %2209 = vset.pattern.permute.xlu1 %v2294_v0 }
  0x85   : > { %588 = vperm.xlu1 %2209, %v299_v32  }
  0x87   : > { %609 = vperm.xlu0 %2214, %v2443_v34  }
  0x89   : > { %2210 = vset.pattern.permute.xlu1 %v2295_v20 }
  0x8a   : > { %386 = vperm.xlu1 %2210, %v301_v30  }
  0x8e   : > { %2211 = vset.pattern.permute.xlu1 %v2294_v0 }
  0x8f   : > { %591 = vperm.xlu1 %2211, %v300_v24  }
  0x93   : > { %2212 = vset.pattern.permute.xlu1 %v2295_v20 }
  0x94   : > { %389 = vperm.xlu1 %2212, %v302_v31  }
  0x98   : > { %v526_v38 = vpop.permute.xlu1 %525  ;;  %392 = vperm.xlu1 %2212, %v303_v36   ;;  %v520_v39 = vpop.permute.xlu0 %519 }
  0x99   : > { %vm614_vm1 = vcmp.eq.s32.totalorder %v520_v39, %v2450_v37  ;;  %vm616_vm2 = vcmp.eq.s32.totalorder %v526_v38, %v2450_v37 }
  0x9a   : > { %v1854_v41 = vsel %vm614_vm1, 1.0, %v2296_v40  ;;  %v1856_v44 = vsel %vm616_vm2, 1.0, %v2296_v40 }
  0x9c   : > { %v529_v42 = vpop.permute.xlu1 %528  ;;  %2213 = vset.pattern.permute.xlu1 %v2294_v0  ;;  %v523_v43 = vpop.permute.xlu0 %522 }
  0x9d   : > { %vm617_vm3 = vcmp.eq.s32.totalorder %v529_v42, %v2450_v37  ;;  %vm615_vm4 = vcmp.eq.s32.totalorder %v523_v43, %v2450_v37  ;;  %600 = vperm.xlu1 %2213, %v303_v36  }
  0x9e   : > { %v1857_v45 = vsel %vm617_vm3, 1.0, %v2296_v40  ;;  %v1855_v46 = vsel %vm615_vm4, 1.0, %v2296_v40  ;;  %vm965_vm4 = vcmask 392192  }
  0x9f   : > { %v711_v47 = vpack.c.bf16 %v1857_v45, %v1856_v44  ;;  %v710_v48 = vpack.c.bf16 %v1855_v46, %v1854_v41 }
  0xa0   : > { %v535_v49 = vpop.permute.xlu1 %534  ;;  %v532_v50 = vpop.permute.xlu0 %531 }
  0xa1   : > { %vm619_vm6 = vcmp.eq.s32.totalorder %v535_v49, %v2450_v37  ;;  %vm618_vm7 = vcmp.eq.s32.totalorder %v532_v50, %v2450_v37  ;;  %2215 = vset.pattern.permute.xlu1 %v2295_v20  ;;  %2001 = vmatprep.mubr.msk.bf16.mxu0 %vm733_vm5, %v710_v48 }
  0xa2   : > { %v1859_v52 = vsel %vm619_vm6, 1.0, %v2296_v40  ;;  %v1858_v53 = vsel %vm618_vm7, 1.0, %v2296_v40  ;;  %398 = vperm.xlu1 %2215, %v305_v33   ;;  %2002 = vmatmul.mubr.msk.bf16.vlgmr.msra.gmra.mrb[0].mxu0 %vm733_vm5, %v711_v47 }
  0xa3   : > { %v712_v54 = vpack.c.bf16 %v1859_v52, %v1858_v53  ;;  %2034 = vmatpush3.bf16.msra.mxu0 %v2413_v19 }
  0xa4   : > { %v541_v55 = vpop.permute.xlu1 %540  ;;  %v538_v56 = vpop.permute.xlu0 %537  ;;  %2035 = vmatprep.subr.bf16.mxu0 %v2220_v51 }
  0xa5   : > { %vm621_vm8 = vcmp.eq.s32.totalorder %v541_v55, %v2450_v37  ;;  %vm620_vm9 = vcmp.eq.s32.totalorder %v538_v56, %v2450_v37  ;;  %2005 = vmatprep.mubr.msk.bf16.mxu0 %vm733_vm5, %v712_v54 }
  0xa6   : > { %v1861_v58 = vsel %vm621_vm8, 1.0, %v2296_v40  ;;  %v1860_v59 = vsel %vm620_vm9, 1.0, %v2296_v40  ;;  %2216 = vset.pattern.permute.xlu1 %v2294_v0 }
  0xa7   : > { %v713_v60 = vpack.c.bf16 %v1861_v58, %v1860_v59  ;;  %603 = vperm.xlu1 %2216, %v2426_v26   ;;  %2036 = vmatpush3.bf16.msra.mxu0 %v2220_v51 }
  0xa8   : > { %v547_v61 = vpop.permute.xlu1 %546  ;;  %v544_v62 = vpop.permute.xlu0 %543  ;;  %2037 = vmatprep.subr.bf16.mxu0 %v2221_v57 }
  0xa9   : > { %vm623_vm10 = vcmp.eq.s32.totalorder %v547_v61, %v2450_v37  ;;  %vm622_vm11 = vcmp.eq.s32.totalorder %v544_v62, %v2450_v37 }
  0xaa   : > { %v1863_v63 = vsel %vm623_vm10, 1.0, %v2296_v40  ;;  %v1862_v1 = vsel %vm622_vm11, 1.0, %v2296_v40  ;;  %2006 = vmatmul.mubr.msk.bf16.gmra.mrb[4].mxu0 %vm733_vm5, %v713_v60 }
  0xab   : > { %v714_v2 = vpack.c.bf16 %v1863_v63, %v1862_v1  ;;  %2217 = vset.pattern.permute.xlu1 %v2295_v20  ;;  %2038 = vmatpush3.bf16.msra.mxu0 %v2221_v57 }
  0xac   : > { %v553_v3 = vpop.permute.xlu1 %552  ;;  %401 = vperm.xlu1 %2217, %v2443_v34   ;;  %v550_v4 = vpop.permute.xlu0 %549 }
  0xad   : > { %vm625_vm12 = vcmp.eq.s32.totalorder %v553_v3, %v2450_v37  ;;  %vm624_vm13 = vcmp.eq.s32.totalorder %v550_v4, %v2450_v37  ;;  %2009 = vmatprep.mubr.msk.bf16.mxu0 %vm733_vm5, %v714_v2 }
  0xae   : > { %v1865_v6 = vsel %vm625_vm12, 1.0, %v2296_v40  ;;  %v1864_v7 = vsel %vm624_vm13, 1.0, %v2296_v40 }
  0xaf   : > { %v715_v8 = vpack.c.bf16 %v1865_v6, %v1864_v7 }
  0xb0   : > { %v559_v9 = vpop.permute.xlu1 %558  ;;  %404 = vperm.xlu1 %2217, %v307_v5   ;;  %v556_v10 = vpop.permute.xlu0 %555 }
  0xb1   : > { %vm627_vm14 = vcmp.eq.s32.totalorder %v559_v9, %v2450_v37  ;;  %vm626_vm15 = vcmp.eq.s32.totalorder %v556_v10, %v2450_v37 }
  0xb2   : > { %v1867_v11 = vsel %vm627_vm14, 1.0, %v2296_v40  ;;  %v1866_v12 = vsel %vm626_vm15, 1.0, %v2296_v40  ;;  %2010 = vmatmul.mubr.msk.bf16.gmra.mrb[8].mxu0 %vm733_vm5, %v715_v8 }
  0xb3   : > { %v716_v13 = vpack.c.bf16 %v1867_v11, %v1866_v12 }
  0xb4   : > { %v565_v14 = vpop.permute.xlu1 %564  ;;  %2218 = vset.pattern.permute.xlu1 %v2294_v0  ;;  %v562_v15 = vpop.permute.xlu0 %561 }
  0xb5   : > { %vm629_vm0 = vcmp.eq.s32.totalorder %v565_v14, %v2450_v37  ;;  %vm628_vm1 = vcmp.eq.s32.totalorder %v562_v15, %v2450_v37  ;;  %612 = vperm.xlu1 %2218, %v307_v5   ;;  %2013 = vmatprep.mubr.msk.bf16.mxu0 %vm733_vm5, %v716_v13 }
  0xb6   : > { %v1869_v16 = vsel %vm629_vm0, 1.0, %v2296_v40  ;;  %v1868_v17 = vsel %vm628_vm1, 1.0, %v2296_v40 }
  0xb7   : > { %v717_v18 = vpack.c.bf16 %v1869_v16, %v1868_v17 }
  0xb9   : > { %v315_v19 = vpop.permute.xlu1 %314  ;;  %v312_v20 = vpop.permute.xlu0 %311 }
  0xba   : > { %vm407_vm2 = vcmp.eq.s32.totalorder %v315_v19, %v2450_v37  ;;  %vm406_vm3 = vcmp.eq.s32.totalorder %v312_v20, %v2450_v37  ;;  %2014 = vmatmul.mubr.msk.bf16.gmra.mrb[12].mxu0 %vm733_vm5, %v717_v18 }
  0xbb   : > { %v1823_v0 = vsel %vm407_vm2, 1.0, %v2296_v40  ;;  %v1822_v22 = vsel %vm406_vm3, 1.0, %v2296_v40 }
  0xbc   : > { %v502_v23 = vpack.c.bf16 %v1823_v0, %v1822_v22  ;;  %v2223_v22 = vld [vmem:[%s2831_s4 + $0x8] sm:$0xff]  }
  0xbd   : > { %v318_v24 = vpop.permute.xlu1 %317  ;;  %v321_v25 = vpop.permute.xlu0 %320 }
  0xbe   : > { %vm408_vm6 = vcmp.eq.s32.totalorder %v318_v24, %v2450_v37  ;;  %vm409_vm7 = vcmp.eq.s32.totalorder %v321_v25, %v2450_v37  ;;  %2039 = vmatprep.mubr.msk.bf16.mxu0 %vm965_vm4, %v502_v23 }
  0xbf   : > { %v1824_v26 = vsel %vm408_vm6, 1.0, %v2296_v40  ;;  %v1825_v27 = vsel %vm409_vm7, 1.0, %v2296_v40 }
  0xc0   : > { %v503_v28 = vpack.c.bf16 %v1825_v27, %v1824_v26  ;;  %v2224_v27 = vld [vmem:[%s2831_s4 + $0x10] sm:$0xff]  }
  0xc1   : > { %v324_v29 = vpop.permute.xlu1 %323  ;;  %v327_v30 = vpop.permute.xlu0 %326 }
  0xc2   : > { %vm410_vm8 = vcmp.eq.s32.totalorder %v324_v29, %v2450_v37  ;;  %vm411_vm9 = vcmp.eq.s32.totalorder %v327_v30, %v2450_v37  ;;  %2040 = vmatmul.mubr.msk.bf16.vlgmr.msra.gmra.mrb[0].mxu0 %vm965_vm4, %v503_v28 }
  0xc3   : > { %v1826_v31 = vsel %vm410_vm8, 1.0, %v2296_v40  ;;  %v1827_v32 = vsel %vm411_vm9, 1.0, %v2296_v40 }
  0xc4   : > { %v504_v33 = vpack.c.bf16 %v1827_v32, %v1826_v31 }
  0xc5   : > { %v330_v34 = vpop.permute.xlu1 %329  ;;  %v333_v35 = vpop.permute.xlu0 %332 }
  0xc6   : > { %vm412_vm10 = vcmp.eq.s32.totalorder %v330_v34, %v2450_v37  ;;  %vm413_vm11 = vcmp.eq.s32.totalorder %v333_v35, %v2450_v37  ;;  %2043 = vmatprep.mubr.msk.bf16.mxu0 %vm965_vm4, %v504_v33  ;;  %v2226_v33 = vld [vmem:[%s2831_s4 + $0x20] sm:$0xff]  }
  0xc7   : > { %v1828_v36 = vsel %vm412_vm10, 1.0, %v2296_v40  ;;  %v1829_v38 = vsel %vm413_vm11, 1.0, %v2296_v40 }
  0xc8   : > { %v505_v39 = vpack.c.bf16 %v1829_v38, %v1828_v36 }
  0xc9   : > { %v336_v41 = vpop.permute.xlu1 %335  ;;  %v339_v42 = vpop.permute.xlu0 %338 }
  0xca   : > { %vm414_vm12 = vcmp.eq.s32.totalorder %v336_v41, %v2450_v37  ;;  %vm415_vm13 = vcmp.eq.s32.totalorder %v339_v42, %v2450_v37  ;;  %2044 = vmatmul.mubr.msk.bf16.gmra.mrb[4].mxu0 %vm965_vm4, %v505_v39  ;;  %v2227_v39 = vld [vmem:[%s2831_s4 + $0x28] sm:$0xff]  }
  0xcb   : > { %v1830_v43 = vsel %vm414_vm12, 1.0, %v2296_v40  ;;  %v1831_v44 = vsel %vm415_vm13, 1.0, %v2296_v40 }
  0xcc   : > { %v506_v45 = vpack.c.bf16 %v1831_v44, %v1830_v43 }
  0xcd   : > { %v342_v46 = vpop.permute.xlu1 %341  ;;  %v345_v47 = vpop.permute.xlu0 %344 }
  0xce   : > { %vm416_vm14 = vcmp.eq.s32.totalorder %v342_v46, %v2450_v37  ;;  %vm417_vm15 = vcmp.eq.s32.totalorder %v345_v47, %v2450_v37  ;;  %2047 = vmatprep.mubr.msk.bf16.mxu0 %vm965_vm4, %v506_v45 }
  0xcf   : > { %v1832_v48 = vsel %vm416_vm14, 1.0, %v2296_v40  ;;  %v1833_v49 = vsel %vm417_vm15, 1.0, %v2296_v40 }
  0xd0   : > { %v507_v50 = vpack.c.bf16 %v1833_v49, %v1832_v48 }
  0xd1   : > { %v348_v51 = vpop.permute.xlu1 %347  ;;  %v351_v52 = vpop.permute.xlu0 %350 }
  0xd2   : > { %vm418_vm0 = vcmp.eq.s32.totalorder %v348_v51, %v2450_v37  ;;  %vm419_vm1 = vcmp.eq.s32.totalorder %v351_v52, %v2450_v37  ;;  %2048 = vmatmul.mubr.msk.bf16.gmra.mrb[8].mxu0 %vm965_vm4, %v507_v50 }
  0xd3   : > { %v1834_v53 = vsel %vm418_vm0, 1.0, %v2296_v40  ;;  %v1835_v54 = vsel %vm419_vm1, 1.0, %v2296_v40 }
  0xd4   : > { %v508_v55 = vpack.c.bf16 %v1835_v54, %v1834_v53 }
  0xd5   : > { %v354_v56 = vpop.permute.xlu1 %353  ;;  %v357_v57 = vpop.permute.xlu0 %356 }
  0xd6   : > { %vm420_vm2 = vcmp.eq.s32.totalorder %v354_v56, %v2450_v37  ;;  %vm421_vm3 = vcmp.eq.s32.totalorder %v357_v57, %v2450_v37  ;;  %2051 = vmatprep.mubr.msk.bf16.mxu0 %vm965_vm4, %v508_v55  ;;  %v2228_v56 = vld [vmem:[%s2831_s4 + $0x30] sm:$0xff]  }
  0xd7   : > { %v1836_v58 = vsel %vm420_vm2, 1.0, %v2296_v40  ;;  %v1837_v59 = vsel %vm421_vm3, 1.0, %v2296_v40 }
  0xd8   : > { %v509_v60 = vpack.c.bf16 %v1837_v59, %v1836_v58 }
  0xd9   : > { %v360_v61 = vpop.permute.xlu1 %359  ;;  %v363_v62 = vpop.permute.xlu0 %362 }
  0xda   : > { %vm422_vm6 = vcmp.eq.s32.totalorder %v360_v61, %v2450_v37  ;;  %vm423_vm7 = vcmp.eq.s32.totalorder %v363_v62, %v2450_v37  ;;  %2052 = vmatmul.mubr.msk.bf16.gmra.mrb[12].mxu0 %vm965_vm4, %v509_v60  ;;  %v2229_v62 = vld [vmem:[%s2831_s4 + $0x38] sm:$0xff]  }
  0xdb   : > { %v1838_v63 = vsel %vm422_vm6, 1.0, %v2296_v40  ;;  %v1839_v1 = vsel %vm423_vm7, 1.0, %v2296_v40 }
  0xdc   : > { %v510_v2 = vpack.c.bf16 %v1839_v1, %v1838_v63 }
  0xdd   : > { %v372_v3 = vpop.permute.xlu0 %371 }
  0xde   : > { %v568_v4 = vpop.permute.xlu1 %567  ;;  %2055 = vmatprep.mubr.msk.bf16.mxu0 %vm965_vm4, %v510_v2  ;;  %vm426_vm14 = vcmp.eq.s32.totalorder %v372_v3, %v2450_v37 }
  0xdf   : > { %vm630_vm10 = vcmp.eq.s32.totalorder %v568_v4, %v2450_v37  ;;  %v1842_v24 = vsel %vm426_vm14, 1.0, %v2296_v40 }
  0xe0   : > { %v1870_v13 = vsel %vm630_vm10, 1.0, %v2296_v40 }
  0xe1   : > { %v2558_v5 = vpop.permute.xlu0 %383 }
  0xe3   : > { %v366_v6 = vpop.permute.xlu1 %365 }
  0xe4   : > { %vm424_vm8 = vcmp.eq.s32.totalorder %v366_v6, %v2450_v37 }
  0xe5   : > { %v2560_v7 = vpop.permute.xlu0 %395  ;;  %v1840_v9 = vsel %vm424_vm8, 1.0, %v2296_v40  ;;  %vm430_vm8 = vcmp.eq.s32.totalorder %v2558_v5, %v2450_v37 }
  0xe6   : > { %v1846_v48 = vsel %vm430_vm8, 1.0, %v2296_v40 }
  0xe7   : > { %v369_v8 = vpop.permute.xlu1 %368 }
  0xe8   : > { %vm425_vm9 = vcmp.eq.s32.totalorder %v369_v8, %v2450_v37 }
  0xe9   : > { %v1841_v10 = vsel %vm425_vm9, 1.0, %v2296_v40 }
  0xea   : > { %v511_v11 = vpack.c.bf16 %v1841_v10, %v1840_v9  ;;  %v571_v12 = vpop.permute.xlu0 %570 }
  0xeb   : > { %vm631_vm11 = vcmp.eq.s32.totalorder %v571_v12, %v2450_v37 }
  0xec   : > { %v1871_v14 = vsel %vm631_vm11, 1.0, %v2296_v40  ;;  %v577_v15 = vpop.permute.xlu1 %576  ;;  %2056 = vmatmul.mubr.msk.bf16.gmra.mrb[16].mxu0 %vm965_vm4, %v511_v11 }
  0xed   : > { %vm633_vm12 = vcmp.eq.s32.totalorder %v577_v15, %v2450_v37  ;;  %v718_v16 = vpack.c.bf16 %v1871_v14, %v1870_v13 }
  0xee   : > { %v574_v17 = vpop.permute.xlu0 %573  ;;  %v1873_v18 = vsel %vm633_vm12, 1.0, %v2296_v40 }
  0xef   : > { %vm632_vm13 = vcmp.eq.s32.totalorder %v574_v17, %v2450_v37  ;;  %2017 = vmatprep.mubr.msk.bf16.mxu1 %vm733_vm5, %v718_v16 }
  0xf0   : > { %v1872_v19 = vsel %vm632_vm13, 1.0, %v2296_v40 }
  0xf1   : > { %v719_v20 = vpack.c.bf16 %v1873_v18, %v1872_v19  ;;  %v375_v0 = vpop.permute.xlu1 %374 }
  0xf2   : > { %vm427_vm15 = vcmp.eq.s32.totalorder %v375_v0, %v2450_v37  ;;  %v583_v23 = vpop.permute.xlu0 %582 }
  0xf3   : > { %v1843_v25 = vsel %vm427_vm15, 1.0, %v2296_v40  ;;  %2018 = vmatmul.mubr.msk.bf16.vlgmr.msra.gmra.mrb[0].mxu1 %vm733_vm5, %v719_v20  ;;  %vm635_vm0 = vcmp.eq.s32.totalorder %v583_v23, %v2450_v37  ;;  %v2664_v23 = vld [vmem:[%s2832_s5] ss:$0 sm:$0xff] }
  0xf4   : > { %v512_v26 = vpack.c.bf16 %v1843_v25, %v1842_v24  ;;  %2072 = vmatpush3.bf16.msra.mxu1 %v2509_v21  ;;  %v1875_v29 = vsel %vm635_vm0, 1.0, %v2296_v40  ;;  %v2225_v21 = vld [vmem:[%s2831_s4 + $0x18] sm:$0xff]   ;;  %vm434_vm0 = vcmp.eq.s32.totalorder %v2560_v7, %v2450_v37 }
  0xf5   : > { %2073 = vmatprep.subr.bf16.mxu1 %v2223_v22  ;;  %v1850_v5 = vsel %vm434_vm0, 1.0, %v2296_v40 }
  0xf6   : > { %v580_v28 = vpop.permute.xlu1 %579  ;;  %2059 = vmatprep.mubr.msk.bf16.mxu0 %vm965_vm4, %v512_v26  ;;  %v586_v34 = vpop.permute.xlu0 %585 }
  0xf7   : > { %vm634_vm1 = vcmp.eq.s32.totalorder %v580_v28, %v2450_v37  ;;  %vm636_vm6 = vcmp.eq.s32.totalorder %v586_v34, %v2450_v37 }
  0xf8   : > { %v1874_v30 = vsel %vm634_vm1, 1.0, %v2296_v40  ;;  %2074 = vmatpush3.bf16.msra.mxu1 %v2223_v22  ;;  %v1876_v43 = vsel %vm636_vm6, 1.0, %v2296_v40 }
  0xf9   : > { %v720_v31 = vpack.c.bf16 %v1875_v29, %v1874_v30  ;;  %2075 = vmatprep.subr.bf16.mxu1 %v2224_v27 }
  0xfa   : > { %v595_v47 = vpop.permute.xlu0 %594 }
  0xfb   : > { %v378_v32 = vpop.permute.xlu1 %377  ;;  %2021 = vmatprep.mubr.msk.bf16.mxu1 %vm733_vm5, %v720_v31  ;;  %vm639_vm10 = vcmp.eq.s32.totalorder %v595_v47, %v2450_v37 }
  0xfc   : > { %2076 = vmatpush3.bf16.msra.mxu1 %v2224_v27  ;;  %vm428_vm2 = vcmp.eq.s32.totalorder %v378_v32, %v2450_v37  ;;  %v1879_v51 = vsel %vm639_vm10, 1.0, %v2296_v40  ;;  %vm1678_vm10 = vcmask 1043459  }
  0xfd   : > { %2077 = vmatprep.subr.bf16.mxu1 %v2225_v21  ;;  %v1844_v36 = vsel %vm428_vm2, 1.0, %v2296_v40 }
  0xfe   : > { %v598_v60 = vpop.permute.xlu0 %597 }
  0xff   : > { %v381_v35 = vpop.permute.xlu1 %380  ;;  %vm640_vm14 = vcmp.eq.s32.totalorder %v598_v60, %v2450_v37 }
 0x100   : > { %vm429_vm3 = vcmp.eq.s32.totalorder %v381_v35, %v2450_v37  ;;  %2078 = vmatpush3.bf16.msra.mxu1 %v2225_v21  ;;  %v1880_v1 = vsel %vm640_vm14, 1.0, %v2296_v40  ;;  %vm1690_vm14 = vcmask 1047559  }
 0x101   : > { %v1845_v38 = vsel %vm429_vm3, 1.0, %v2296_v40  ;;  %2079 = vmatprep.subr.bf16.mxu1 %v2226_v33 }
 0x102   : > { %v513_v41 = vpack.c.bf16 %v1845_v38, %v1844_v36  ;;  %v607_v8 = vpop.permute.xlu0 %606 }
 0x103   : > { %vm643_vm2 = vcmp.eq.s32.totalorder %v607_v8, %v2450_v37 }
 0x104   : > { %v589_v42 = vpop.permute.xlu1 %588  ;;  %2060 = vmatmul.mubr.msk.bf16.gmra.mrb[20].mxu0 %vm965_vm4, %v513_v41  ;;  %2080 = vmatpush3.bf16.msra.mxu1 %v2226_v33  ;;  %v1883_v7 = vsel %vm643_vm2, 1.0, %v2296_v40 }
 0x105   : > { %vm637_vm7 = vcmp.eq.s32.totalorder %v589_v42, %v2450_v37  ;;  %2081 = vmatprep.subr.bf16.mxu1 %v2227_v39 }
 0x106   : > { %v1877_v44 = vsel %vm637_vm7, 1.0, %v2296_v40  ;;  %v610_v15 = vpop.permute.xlu0 %609 }
 0x107   : > { %v721_v45 = vpack.c.bf16 %v1877_v44, %v1876_v43  ;;  %vm644_vm8 = vcmp.eq.s32.totalorder %v610_v15, %v2450_v37 }
 0x108   : > { %2082 = vmatpush3.bf16.msra.mxu1 %v2227_v39  ;;  %v1884_v20 = vsel %vm644_vm8, 1.0, %v2296_v40 }
 0x109   : > { %v387_v46 = vpop.permute.xlu1 %386  ;;  %2022 = vmatmul.mubr.msk.bf16.gmra.mrb[4].mxu1 %vm733_vm5, %v721_v45  ;;  %2083 = vmatprep.subr.bf16.mxu1 %v2228_v56 }
 0x10a   : > { %vm431_vm9 = vcmp.eq.s32.totalorder %v387_v46, %v2450_v37 }
 0x10b   : > { %v1847_v49 = vsel %vm431_vm9, 1.0, %v2296_v40 }
 0x10c   : > { %v514_v50 = vpack.c.bf16 %v1847_v49, %v1846_v48  ;;  %2084 = vmatpush3.bf16.msra.mxu1 %v2228_v56 }
 0x10d   : > { %2085 = vmatprep.subr.bf16.mxu1 %v2229_v62 }
 0x10e   : > { %v592_v52 = vpop.permute.xlu1 %591  ;;  %2063 = vmatprep.mubr.msk.bf16.mxu0 %vm965_vm4, %v514_v50 }
 0x10f   : > { %vm638_vm11 = vcmp.eq.s32.totalorder %v592_v52, %v2450_v37 }
 0x110   : > { %v1878_v53 = vsel %vm638_vm11, 1.0, %v2296_v40  ;;  %2086 = vmatpush3.bf16.msra.mxu1 %v2229_v62  ;;  %vm1681_vm11 = vcmask 1044484  }
 0x111   : > { %v722_v54 = vpack.c.bf16 %v1879_v51, %v1878_v53 }
 0x113   : > { %v390_v55 = vpop.permute.xlu1 %389  ;;  %2025 = vmatprep.mubr.msk.bf16.mxu1 %vm733_vm5, %v722_v54 }
 0x114   : > { %vm432_vm12 = vcmp.eq.s32.totalorder %v390_v55, %v2450_v37 }
 0x115   : > { %v1848_v58 = vsel %vm432_vm12, 1.0, %v2296_v40  ;;  %vm1684_vm12 = vcmask 1045509  }
 0x117   : > { %v393_v57 = vpop.permute.xlu1 %392 }
 0x118   : > { %vm433_vm13 = vcmp.eq.s32.totalorder %v393_v57, %v2450_v37 }
 0x119   : > { %v1849_v59 = vsel %vm433_vm13, 1.0, %v2296_v40  ;;  %vm1687_vm13 = vcmask 1046534  }
 0x11a   : > { %v515_v61 = vpack.c.bf16 %v1849_v59, %v1848_v58 }
 0x11c   : > { %v601_v63 = vpop.permute.xlu1 %600  ;;  %2064 = vmatmul.mubr.msk.bf16.gmra.mrb[24].mxu0 %vm965_vm4, %v515_v61 }
 0x11d   : > { %vm641_vm15 = vcmp.eq.s32.totalorder %v601_v63, %v2450_v37 }
 0x11e   : > { %v1881_v2 = vsel %vm641_vm15, 1.0, %v2296_v40 }
 0x11f   : > { %v723_v3 = vpack.c.bf16 %v1881_v2, %v1880_v1 }
 0x121   : > { %v399_v4 = vpop.permute.xlu1 %398  ;;  %2026 = vmatmul.mubr.msk.bf16.gmra.mrb[8].mxu1 %vm733_vm5, %v723_v3 }
 0x122   : > { %vm435_vm1 = vcmp.eq.s32.totalorder %v399_v4, %v2450_v37 }
 0x123   : > { %v1851_v6 = vsel %vm435_vm1, 1.0, %v2296_v40 }
 0x124   : > { %v516_v9 = vpack.c.bf16 %v1851_v6, %v1850_v5 }
 0x126   : > { %v604_v10 = vpop.permute.xlu1 %603  ;;  %2067 = vmatprep.mubr.msk.bf16.mxu0 %vm965_vm4, %v516_v9 }
 0x127   : > { %vm642_vm3 = vcmp.eq.s32.totalorder %v604_v10, %v2450_v37 }
 0x128   : > { %v1882_v11 = vsel %vm642_vm3, 1.0, %v2296_v40 }
 0x129   : > { %v724_v12 = vpack.c.bf16 %v1883_v7, %v1882_v11 }
 0x12b   : > { %v402_v13 = vpop.permute.xlu1 %401  ;;  %2029 = vmatprep.mubr.msk.bf16.mxu1 %vm733_vm5, %v724_v12 }
 0x12c   : > { %vm436_vm6 = vcmp.eq.s32.totalorder %v402_v13, %v2450_v37 }
 0x12d   : > { %v1852_v16 = vsel %vm436_vm6, 1.0, %v2296_v40 }
 0x12f   : > { %v405_v14 = vpop.permute.xlu1 %404 }
 0x130   : > { %vm437_vm7 = vcmp.eq.s32.totalorder %v405_v14, %v2450_v37 }
 0x131   : > { %v1853_v17 = vsel %vm437_vm7, 1.0, %v2296_v40 }
 0x132   : > { %v517_v18 = vpack.c.bf16 %v1853_v17, %v1852_v16 }
 0x134   : > { %v613_v19 = vpop.permute.xlu1 %612  ;;  %2068 = vmatmul.mubr.msk.bf16.gmra.mrb[28].mxu0 %vm965_vm4, %v517_v18  ;;  %vm1675_vm4 = vcmask 1042434  }
 0x135   : > { %vm645_vm9 = vcmp.eq.s32.totalorder %v613_v19, %v2450_v37 }
 0x136   : > { %v1885_v0 = vsel %vm645_vm9, 1.0, %v2296_v40 }
 0x137   : > { %v725_v22 = vpack.c.bf16 %v1885_v0, %v1884_v20 }
 0x139   : > { %2030 = vmatmul.mubr.msk.bf16.gmra.mrb[12].mxu1 %vm733_vm5, %v725_v22  ;;  %vm1672_vm5 = vcmask 1041409  }
 0x195   : > { %v2041_v24 = vpop.f32.mrb[0].mxu0 }
 0x196   : > { %v1182_v25 = vadd.f32 %v2041_v24, %v2664_v23  ;;  %v1048_v26 = vpop.f32.mrb[1].mxu0 }
 0x197   : > { %v1180_v27 = vadd.f32 %v2664_v23, %v1048_v26  ;;  %v2042_v28 = vpop.f32.mrb[2].mxu0 }
 0x198   : > { %v1183_v37 = vadd.f32 %v2042_v28, %v2664_v23  ;;  %v1051_v29 = vpop.f32.mrb[3].mxu0  ;;  %v1214_v30 = vmax.f32 %v1182_v25, 0.0 }
 0x199   : > { %v1181_v40 = vadd.f32 %v2664_v23, %v1051_v29  ;;  %v1212_v21 = vmax.f32 %v1180_v27, 0.0 }
 0x19a   : > { %v1215_v31 = vmax.f32 %v1183_v37, 0.0 }
 0x19b   : > { %v1213_v32 = vmax.f32 %v1181_v40, 0.0 }
 0x19c   : > { %v1245_v33 = vpack.c.bf16 %v1215_v31, %v1214_v30 }
 0x19d   : > { %v1244_v34 = vpack.c.bf16 %v1213_v32, %v1212_v21  ;;  %v2045_v35 = vpop.f32.mrb[4].mxu0 }
 0x19e   : > { %v1186_v36 = vadd.f32 %v2045_v35, %v2664_v23  ;;  %v1064_v38 = vpop.f32.mrb[5].mxu0 }
 0x19f   : > { %v1184_v39 = vadd.f32 %v2664_v23, %v1064_v38  ;;  %v2046_v41 = vpop.f32.mrb[6].mxu0  ;;  %2087 = vmatprep.mubr.bf16.mxu1 %v1244_v34 }
 0x1a0   : > { %v1187_v42 = vadd.f32 %v2046_v41, %v2664_v23  ;;  %v1067_v43 = vpop.f32.mrb[7].mxu0  ;;  %2088 = vmatmul.mubr.bf16.vlgmr.msra.gmra.mrb[16].mxu1 %v1245_v33  ;;  %v1218_v45 = vmax.f32 %v1186_v36, 0.0 }
 0x1a1   : > { %v1185_v44 = vadd.f32 %v2664_v23, %v1067_v43  ;;  %v1216_v47 = vmax.f32 %v1184_v39, 0.0 }
 0x1a2   : > { %v1219_v46 = vmax.f32 %v1187_v42, 0.0 }
 0x1a3   : > { %v1217_v48 = vmax.f32 %v1185_v44, 0.0 }
 0x1a4   : > { %v1247_v49 = vpack.c.bf16 %v1219_v46, %v1218_v45 }
 0x1a5   : > { %v1246_v50 = vpack.c.bf16 %v1217_v48, %v1216_v47  ;;  %v2049_v51 = vpop.f32.mrb[8].mxu0 }
 0x1a6   : > { %v1190_v52 = vadd.f32 %v2049_v51, %v2664_v23  ;;  %v1080_v53 = vpop.f32.mrb[9].mxu0 }
 0x1a7   : > { %v1188_v54 = vadd.f32 %v2664_v23, %v1080_v53  ;;  %v2050_v55 = vpop.f32.mrb[10].mxu0  ;;  %2091 = vmatprep.mubr.bf16.mxu1 %v1246_v50 }
 0x1a8   : > { %v1191_v56 = vadd.f32 %v2050_v55, %v2664_v23  ;;  %v1083_v57 = vpop.f32.mrb[11].mxu0  ;;  %2092 = vmatmul.mubr.bf16.gmra.mrb[20].mxu1 %v1247_v49  ;;  %v1222_v59 = vmax.f32 %v1190_v52, 0.0 }
 0x1a9   : > { %v1189_v58 = vadd.f32 %v2664_v23, %v1083_v57  ;;  %v1220_v61 = vmax.f32 %v1188_v54, 0.0 }
 0x1aa   : > { %v1223_v60 = vmax.f32 %v1191_v56, 0.0 }
 0x1ab   : > { %v1221_v62 = vmax.f32 %v1189_v58, 0.0 }
 0x1ac   : > { %v1249_v63 = vpack.c.bf16 %v1223_v60, %v1222_v59 }
 0x1ad   : > { %v1248_v1 = vpack.c.bf16 %v1221_v62, %v1220_v61  ;;  %v2053_v2 = vpop.f32.mrb[12].mxu0 }
 0x1ae   : > { %v1194_v3 = vadd.f32 %v2053_v2, %v2664_v23  ;;  %v1096_v4 = vpop.f32.mrb[13].mxu0 }
 0x1af   : > { %v1192_v5 = vadd.f32 %v2664_v23, %v1096_v4  ;;  %v2054_v6 = vpop.f32.mrb[14].mxu0  ;;  %2095 = vmatprep.mubr.bf16.mxu1 %v1248_v1 }
 0x1b0   : > { %v1195_v8 = vadd.f32 %v2054_v6, %v2664_v23  ;;  %v1099_v9 = vpop.f32.mrb[15].mxu0  ;;  %2096 = vmatmul.mubr.bf16.gmra.mrb[24].mxu1 %v1249_v63  ;;  %v1226_v7 = vmax.f32 %v1194_v3, 0.0 }
 0x1b1   : > { %v1193_v10 = vadd.f32 %v2664_v23, %v1099_v9  ;;  %v1224_v12 = vmax.f32 %v1192_v5, 0.0 }
 0x1b2   : > { %v1227_v11 = vmax.f32 %v1195_v8, 0.0 }
 0x1b3   : > { %v1225_v13 = vmax.f32 %v1193_v10, 0.0 }
 0x1b4   : > { %v1251_v14 = vpack.c.bf16 %v1227_v11, %v1226_v7 }
 0x1b5   : > { %v1250_v15 = vpack.c.bf16 %v1225_v13, %v1224_v12 }
 0x1b7   : > { %2099 = vmatprep.mubr.bf16.mxu1 %v1250_v15 }
 0x1b8   : > { %2100 = vmatmul.mubr.bf16.gmra.mrb[28].mxu1 %v1251_v14 }
 0x1bf   : > { %v2057_v16 = vpop.f32.mrb[16].mxu0 }
 0x1c0   : > { %v1112_v17 = vpop.f32.mrb[17].mxu0 }
 0x1c1   : > { %v2058_v18 = vpop.f32.mrb[18].mxu0 }
 0x1c2   : > { %v1115_v19 = vpop.f32.mrb[19].mxu0 }
 0x1c6   : > { %v2019_v20 = vpop.f32.mrb[0].mxu1 }
 0x1c7   : > { %v1121_v0 = vadd.f32 %v2057_v16, %v2019_v20  ;;  %v884_v22 = vpop.f32.mrb[1].mxu1 }
 0x1c8   : > { %v1113_v24 = vadd.f32 %v1112_v17, %v884_v22  ;;  %v2020_v25 = vpop.f32.mrb[2].mxu1 }
 0x1c9   : > { %v1198_v26 = vadd.f32 %v2664_v23, %v1121_v0  ;;  %v1124_v27 = vadd.f32 %v2058_v18, %v2020_v25  ;;  %v887_v28 = vpop.f32.mrb[3].mxu1 }
 0x1ca   : > { %v1196_v37 = vadd.f32 %v2664_v23, %v1113_v24  ;;  %v1116_v29 = vadd.f32 %v1115_v19, %v887_v28 }
 0x1cb   : > { %v1199_v40 = vadd.f32 %v2664_v23, %v1124_v27  ;;  %v1230_v31 = vmax.f32 %v1198_v26, 0.0 }
 0x1cc   : > { %v1197_v30 = vadd.f32 %v2664_v23, %v1116_v29  ;;  %v1228_v32 = vmax.f32 %v1196_v37, 0.0 }
 0x1cd   : > { %v1231_v21 = vmax.f32 %v1199_v40, 0.0 }
 0x1ce   : > { %v1229_v33 = vmax.f32 %v1197_v30, 0.0 }
 0x1cf   : > { %v1253_v34 = vpack.c.bf16 %v1231_v21, %v1230_v31 }
 0x1d0   : > { %v1252_v35 = vpack.c.bf16 %v1229_v33, %v1228_v32 }
 0x1d2   : > { %2103 = vmatprep.mubr.bf16.mxu1 %v1252_v35 }
 0x1d3   : > { %2104 = vmatmul.mubr.bf16.gmra.mrb[32].mxu1 %v1253_v34 }
 0x1d7   : > { %v2061_v36 = vpop.f32.mrb[20].mxu0 }
 0x1d8   : > { %v1128_v38 = vpop.f32.mrb[21].mxu0 }
 0x1d9   : > { %v2062_v39 = vpop.f32.mrb[22].mxu0 }
 0x1da   : > { %v1131_v41 = vpop.f32.mrb[23].mxu0 }
 0x1dc   : > { %v2023_v42 = vpop.f32.mrb[4].mxu1 }
 0x1dd   : > { %v1137_v43 = vadd.f32 %v2061_v36, %v2023_v42  ;;  %v900_v44 = vpop.f32.mrb[5].mxu1 }
 0x1de   : > { %v1129_v45 = vadd.f32 %v1128_v38, %v900_v44  ;;  %v2024_v46 = vpop.f32.mrb[6].mxu1 }
 0x1df   : > { %v1202_v47 = vadd.f32 %v2664_v23, %v1137_v43  ;;  %v1140_v48 = vadd.f32 %v2062_v39, %v2024_v46  ;;  %v903_v49 = vpop.f32.mrb[7].mxu1 }
 0x1e0   : > { %v1200_v50 = vadd.f32 %v2664_v23, %v1129_v45  ;;  %v1132_v51 = vadd.f32 %v1131_v41, %v903_v49  ;;  %v2701_v41 = vld [vmem:[%s2832_s5 + $0x1] ss:$0 sm:$0xff] }
 0x1e1   : > { %v1203_v52 = vadd.f32 %v2664_v23, %v1140_v48  ;;  %v1234_v54 = vmax.f32 %v1202_v47, 0.0 }
 0x1e2   : > { %v1201_v53 = vadd.f32 %v2664_v23, %v1132_v51  ;;  %v1232_v56 = vmax.f32 %v1200_v50, 0.0 }
 0x1e3   : > { %v1235_v55 = vmax.f32 %v1203_v52, 0.0 }
 0x1e4   : > { %v1233_v57 = vmax.f32 %v1201_v53, 0.0 }
 0x1e5   : > { %v1255_v58 = vpack.c.bf16 %v1235_v55, %v1234_v54 }
 0x1e6   : > { %v1254_v59 = vpack.c.bf16 %v1233_v57, %v1232_v56 }
 0x1e8   : > { %2107 = vmatprep.mubr.bf16.mxu1 %v1254_v59 }
 0x1e9   : > { %2108 = vmatmul.mubr.bf16.gmra.mrb[36].mxu1 %v1255_v58 }
 0x1ef   : > { %v2065_v60 = vpop.f32.mrb[24].mxu0 }
 0x1f0   : > { %v1144_v61 = vpop.f32.mrb[25].mxu0 }
 0x1f1   : > { %v2066_v62 = vpop.f32.mrb[26].mxu0 }
 0x1f2   : > { %v1147_v63 = vpop.f32.mrb[27].mxu0 }
 0x1f4   : > { %v2027_v1 = vpop.f32.mrb[8].mxu1 }
 0x1f5   : > { %v1153_v2 = vadd.f32 %v2065_v60, %v2027_v1  ;;  %v916_v3 = vpop.f32.mrb[9].mxu1 }
 0x1f6   : > { %v1145_v4 = vadd.f32 %v1144_v61, %v916_v3  ;;  %v2028_v5 = vpop.f32.mrb[10].mxu1 }
 0x1f7   : > { %v1206_v6 = vadd.f32 %v2664_v23, %v1153_v2  ;;  %v1156_v8 = vadd.f32 %v2066_v62, %v2028_v5  ;;  %v919_v9 = vpop.f32.mrb[11].mxu1 }
 0x1f8   : > { %v1204_v10 = vadd.f32 %v2664_v23, %v1145_v4  ;;  %v1148_v7 = vadd.f32 %v1147_v63, %v919_v9 }
 0x1f9   : > { %v1207_v11 = vadd.f32 %v2664_v23, %v1156_v8  ;;  %v1238_v13 = vmax.f32 %v1206_v6, 0.0 }
 0x1fa   : > { %v1205_v12 = vadd.f32 %v2664_v23, %v1148_v7  ;;  %v1236_v15 = vmax.f32 %v1204_v10, 0.0 }
 0x1fb   : > { %v1239_v14 = vmax.f32 %v1207_v11, 0.0 }
 0x1fc   : > { %v1237_v16 = vmax.f32 %v1205_v12, 0.0 }
 0x1fd   : > { %v1257_v17 = vpack.c.bf16 %v1239_v14, %v1238_v13 }
 0x1fe   : > { %v1256_v18 = vpack.c.bf16 %v1237_v16, %v1236_v15 }
 0x200   : > { %2111 = vmatprep.mubr.bf16.mxu1 %v1256_v18 }
 0x201   : > { %2112 = vmatmul.mubr.bf16.gmra.mrb[40].mxu1 %v1257_v17 }
 0x207   : > { %v2069_v19 = vpop.f32.mrb[28].mxu0 }
 0x208   : > { %v1160_v20 = vpop.f32.mrb[29].mxu0 }
 0x209   : > { %v2070_v0 = vpop.f32.mrb[30].mxu0 }
 0x20a   : > { %v1163_v22 = vpop.f32.mrb[31].mxu0 }
 0x20c   : > { %v2031_v24 = vpop.f32.mrb[12].mxu1 }
 0x20d   : > { %v1169_v25 = vadd.f32 %v2069_v19, %v2031_v24  ;;  %v932_v26 = vpop.f32.mrb[13].mxu1  ;;  %v2715_v19 = vld [vmem:[%s2832_s5 + $0x2] ss:$0 sm:$0xff] }
 0x20e   : > { %v1161_v27 = vadd.f32 %v1160_v20, %v932_v26  ;;  %v2032_v28 = vpop.f32.mrb[14].mxu1 }
 0x20f   : > { %v1210_v37 = vadd.f32 %v2664_v23, %v1169_v25  ;;  %v1172_v29 = vadd.f32 %v2070_v0, %v2032_v28  ;;  %v935_v40 = vpop.f32.mrb[15].mxu1 }
 0x210   : > { %v1208_v30 = vadd.f32 %v2664_v23, %v1161_v27  ;;  %v1164_v31 = vadd.f32 %v1163_v22, %v935_v40 }
 0x211   : > { %v1211_v21 = vadd.f32 %v2664_v23, %v1172_v29  ;;  %v1242_v33 = vmax.f32 %v1210_v37, 0.0 }
 0x212   : > { %v1209_v32 = vadd.f32 %v2664_v23, %v1164_v31  ;;  %v1240_v35 = vmax.f32 %v1208_v30, 0.0 }
 0x213   : > { %v1243_v34 = vmax.f32 %v1211_v21, 0.0 }
 0x214   : > { %v1241_v36 = vmax.f32 %v1209_v32, 0.0 }
 0x215   : > { %v1259_v38 = vpack.c.bf16 %v1243_v34, %v1242_v33 }
 0x216   : > { %v1258_v39 = vpack.c.bf16 %v1241_v36, %v1240_v35 }
 0x218   : > { %2115 = vmatprep.mubr.bf16.mxu1 %v1258_v39 }
 0x219   : > { %2116 = vmatmul.mubr.bf16.gmra.mrb[44].mxu1 %v1259_v38 }
 0x273   : > { %v2089_v42 = vpop.f32.mrb[16].mxu1 }
 0x274   : > { %v1372_v43 = vadd.f32 %v2089_v42, %v2701_v41  ;;  %v1363_v44 = vpop.f32.mrb[17].mxu1 }
 0x275   : > { %v1364_v45 = vadd.f32 %v2701_v41, %v1363_v44  ;;  %v2090_v23 = vpop.f32.mrb[18].mxu1 }
 0x276   : > { %v1375_v46 = vadd.f32 %v2090_v23, %v2701_v41  ;;  %v1366_v47 = vpop.f32.mrb[19].mxu1  ;;  %v1492_v49 = vmax.f32 %v1372_v43, 0.0 }
 0x277   : > { %v1367_v48 = vadd.f32 %v2701_v41, %v1366_v47  ;;  %v1490_v51 = vmax.f32 %v1364_v45, 0.0 }
 0x278   : > { %v1493_v50 = vmax.f32 %v1375_v46, 0.0 }
 0x279   : > { %v1491_v52 = vmax.f32 %v1367_v48, 0.0 }
 0x27a   : > { %v1529_v53 = vadd.f32 %v1493_v50, %v1492_v49 }
 0x27b   : > { %v1522_v54 = vadd.f32 %v1491_v52, %v1490_v51  ;;  %v2093_v55 = vpop.f32.mrb[20].mxu1 }
 0x27c   : > { %v1530_v56 = vrot.slane %v1529_v53, 4  ;;  %v1388_v57 = vadd.f32 %v2093_v55, %v2701_v41  ;;  %v1379_v58 = vpop.f32.mrb[21].mxu1 }
 0x27d   : > { %v1523_v59 = vrot.slane %v1522_v54, 4  ;;  %v1380_v60 = vadd.f32 %v2701_v41, %v1379_v58  ;;  %v2094_v61 = vpop.f32.mrb[22].mxu1 }
 0x27e   : > { %v1531_v62 = vadd.f32 %v1530_v56, %v1529_v53  ;;  %v1391_v63 = vadd.f32 %v2094_v61, %v2701_v41  ;;  %v1382_v1 = vpop.f32.mrb[23].mxu1  ;;  %v1496_v5 = vmax.f32 %v1388_v57, 0.0 }
 0x27f   : > { %v1524_v2 = vadd.f32 %v1523_v59, %v1522_v54  ;;  %v1383_v3 = vadd.f32 %v2701_v41, %v1382_v1  ;;  %v1494_v9 = vmax.f32 %v1380_v60, 0.0 }
 0x280   : > { %v1532_v4 = vrot.slane %v1531_v62, 2  ;;  %v1497_v6 = vmax.f32 %v1391_v63, 0.0 }
 0x281   : > { %v1525_v8 = vrot.slane %v1524_v2, 2  ;;  %v1495_v10 = vmax.f32 %v1383_v3, 0.0 }
 0x282   : > { %v1533_v7 = vadd.f32 %v1532_v4, %v1531_v62  ;;  %v1543_v11 = vadd.f32 %v1497_v6, %v1496_v5 }
 0x283   : > { %v1526_v12 = vadd.f32 %v1525_v8, %v1524_v2  ;;  %v1536_v13 = vadd.f32 %v1495_v10, %v1494_v9  ;;  %v2097_v14 = vpop.f32.mrb[24].mxu1 }
 0x284   : > { %v1534_v15 = vrot.slane %v1533_v7, 1  ;;  %v1544_v16 = vrot.slane %v1543_v11, 4  ;;  %v1404_v17 = vadd.f32 %v2097_v14, %v2701_v41  ;;  %v1395_v18 = vpop.f32.mrb[25].mxu1 }
 0x285   : > { %v1527_v20 = vrot.slane %v1526_v12, 1  ;;  %v1537_v0 = vrot.slane %v1536_v13, 4  ;;  %v1396_v22 = vadd.f32 %v2701_v41, %v1395_v18  ;;  %v2098_v24 = vpop.f32.mrb[26].mxu1 }
 0x286   : > { %v1535_v25 = vadd.f32 %v1534_v15, %v1533_v7  ;;  %v1545_v26 = vadd.f32 %v1544_v16, %v1543_v11  ;;  %v1407_v27 = vadd.f32 %v2098_v24, %v2701_v41  ;;  %v1398_v28 = vpop.f32.mrb[27].mxu1  ;;  %v1500_v21 = vmax.f32 %v1404_v17, 0.0 }
 0x287   : > { %v1528_v37 = vadd.f32 %v1527_v20, %v1526_v12  ;;  %v1538_v29 = vadd.f32 %v1537_v0, %v1536_v13  ;;  %v1399_v40 = vadd.f32 %v2701_v41, %v1398_v28  ;;  %v1498_v35 = vmax.f32 %v1396_v22, 0.0 }
 0x288   : > { %v1640_v30 = vmul.f32 %v2715_v19, %v1535_v25  ;;  %v1546_v31 = vrot.slane %v1545_v26, 2  ;;  %v1501_v32 = vmax.f32 %v1407_v27, 0.0 }
 0x289   : > { %v1639_v33 = vmul.f32 %v2715_v19, %v1528_v37  ;;  %v1539_v34 = vrot.slane %v1538_v29, 2  ;;  %v1499_v36 = vmax.f32 %v1399_v40, 0.0 }
 0x28a   : > { %v1671_v38 = vrot.slane %v1640_v30, 7  ;;  %v1547_v39 = vadd.f32 %v1546_v31, %v1545_v26  ;;  %v1557_v42 = vadd.f32 %v1501_v32, %v1500_v21 }
 0x28b   : > { %v1540_v43 = vadd.f32 %v1539_v34, %v1538_v29  ;;  %v1550_v44 = vadd.f32 %v1499_v36, %v1498_v35  ;;  %v2101_v45 = vpop.f32.mrb[28].mxu1 }
 0x28c   : > { %v1548_v23 = vrot.slane %v1547_v39, 1  ;;  %v1558_v46 = vrot.slane %v1557_v42, 4  ;;  %v1420_v47 = vadd.f32 %v2101_v45, %v2701_v41  ;;  %v1411_v48 = vpop.f32.mrb[29].mxu1  ;;  %v1673_v49 = vsel %vm1672_vm5, %v1671_v38, %v1639_v33 }
 0x28d   : > { %v1541_v50 = vrot.slane %v1540_v43, 1  ;;  %v1551_v51 = vrot.slane %v1550_v44, 4  ;;  %v1412_v52 = vadd.f32 %v2701_v41, %v1411_v48  ;;  %v2102_v53 = vpop.f32.mrb[30].mxu1 }
 0x28e   : > { %v1549_v54 = vadd.f32 %v1548_v23, %v1547_v39  ;;  %v1559_v55 = vadd.f32 %v1558_v46, %v1557_v42  ;;  %v1423_v56 = vadd.f32 %v2102_v53, %v2701_v41  ;;  %v1414_v57 = vpop.f32.mrb[31].mxu1  ;;  %v1504_v63 = vmax.f32 %v1420_v47, 0.0 }
 0x28f   : > { %v1542_v58 = vadd.f32 %v1541_v50, %v1540_v43  ;;  %v1552_v59 = vadd.f32 %v1551_v51, %v1550_v44  ;;  %v1415_v60 = vadd.f32 %v2701_v41, %v1414_v57  ;;  %v1502_v4 = vmax.f32 %v1412_v52, 0.0 }
 0x290   : > { %v1642_v61 = vmul.f32 %v2715_v19, %v1549_v54  ;;  %v1560_v62 = vrot.slane %v1559_v55, 2  ;;  %v1505_v1 = vmax.f32 %v1423_v56, 0.0 }
 0x291   : > { %v1641_v2 = vmul.f32 %v2715_v19, %v1542_v58  ;;  %v1553_v3 = vrot.slane %v1552_v59, 2  ;;  %v1503_v5 = vmax.f32 %v1415_v60, 0.0 }
 0x292   : > { %v1561_v6 = vadd.f32 %v1560_v62, %v1559_v55  ;;  %v1571_v8 = vadd.f32 %v1505_v1, %v1504_v63  ;;  %v1677_v11 = vrot.slane %v1642_v61, 5 }
 0x293   : > { %v1674_v9 = vrot.slane %v1641_v2, 6  ;;  %v1554_v10 = vadd.f32 %v1553_v3, %v1552_v59  ;;  %v1564_v7 = vadd.f32 %v1503_v5, %v1502_v4 }
 0x294   : > { %v1562_v12 = vrot.slane %v1561_v6, 1  ;;  %v1572_v13 = vrot.slane %v1571_v8, 4 }
 0x295   : > { %v1555_v14 = vrot.slane %v1554_v10, 1  ;;  %v1565_v15 = vrot.slane %v1564_v7, 4  ;;  %v1676_v16 = vsel %vm1675_vm4, %v1674_v9, %v1673_v49 }
 0x296   : > { %v1563_v17 = vadd.f32 %v1562_v12, %v1561_v6  ;;  %v1573_v18 = vadd.f32 %v1572_v13, %v1571_v8  ;;  %v1679_v20 = vsel %vm1678_vm10, %v1677_v11, %v1676_v16 }
 0x297   : > { %v1556_v0 = vadd.f32 %v1555_v14, %v1554_v10  ;;  %v1566_v22 = vadd.f32 %v1565_v15, %v1564_v7 }
 0x298   : > { %v1574_v24 = vrot.slane %v1573_v18, 2  ;;  %v1644_v25 = vmul.f32 %v2715_v19, %v1563_v17 }
 0x299   : > { %v1643_v26 = vmul.f32 %v2715_v19, %v1556_v0  ;;  %v1567_v27 = vrot.slane %v1566_v22, 2 }
 0x29a   : > { %v1575_v28 = vadd.f32 %v1574_v24, %v1573_v18  ;;  %v1683_v30 = vrot.slane %v1644_v25, 3 }
 0x29b   : > { %v1680_v37 = vrot.slane %v1643_v26, 4  ;;  %v1568_v29 = vadd.f32 %v1567_v27, %v1566_v22 }
 0x29c   : > { %v1576_v40 = vrot.slane %v1575_v28, 1 }
 0x29d   : > { %v1569_v31 = vrot.slane %v1568_v29, 1  ;;  %v1682_v21 = vsel %vm1681_vm11, %v1680_v37, %v1679_v20 }
 0x29e   : > { %v1577_v32 = vadd.f32 %v1576_v40, %v1575_v28  ;;  %v1685_v33 = vsel %vm1684_vm12, %v1683_v30, %v1682_v21 }
 0x29f   : > { %v1570_v34 = vadd.f32 %v1569_v31, %v1568_v29 }
 0x2a0   : > { %v1646_v35 = vmul.f32 %v2715_v19, %v1577_v32 }
 0x2a1   : > { %v1645_v36 = vmul.f32 %v2715_v19, %v1570_v34 }
 0x2a2   : > { %v1689_v39 = vrot.slane %v1646_v35, 1 }
 0x2a3   : > { %v1686_v38 = vrot.slane %v1645_v36, 2 }
 0x2a5   : > { %v1688_v42 = vsel %vm1687_vm13, %v1686_v38, %v1685_v33 }
 0x2a6   : > { %v2105_v43 = vpop.f32.mrb[32].mxu1  ;;  %v1691_v44 = vsel %vm1690_vm14, %v1689_v39, %v1688_v42 }
 0x2a7   : > { %v1436_v45 = vadd.f32 %v2105_v43, %v2701_v41  ;;  %v1427_v23 = vpop.f32.mrb[33].mxu1  ;;  %1708 = vadd.xlane.f32.xlu0 %v1691_v44 }
 0x2a8   : > { %v1428_v46 = vadd.f32 %v2701_v41, %v1427_v23  ;;  %v2106_v47 = vpop.f32.mrb[34].mxu1 }
 0x2a9   : > { %v1439_v48 = vadd.f32 %v2106_v47, %v2701_v41  ;;  %v1430_v49 = vpop.f32.mrb[35].mxu1  ;;  %v1508_v51 = vmax.f32 %v1436_v45, 0.0 }
 0x2aa   : > { %v1431_v50 = vadd.f32 %v2701_v41, %v1430_v49  ;;  %v1506_v53 = vmax.f32 %v1428_v46, 0.0 }
 0x2ab   : > { %v1509_v52 = vmax.f32 %v1439_v48, 0.0 }
 0x2ac   : > { %v1507_v54 = vmax.f32 %v1431_v50, 0.0 }
 0x2ad   : > { %v1585_v55 = vadd.f32 %v1509_v52, %v1508_v51 }
 0x2ae   : > { %v1578_v56 = vadd.f32 %v1507_v54, %v1506_v53 }
 0x2af   : > { %v1586_v57 = vrot.slane %v1585_v55, 4 }
 0x2b0   : > { %v1579_v58 = vrot.slane %v1578_v56, 4 }
 0x2b1   : > { %v1587_v59 = vadd.f32 %v1586_v57, %v1585_v55 }
 0x2b2   : > { %v1580_v60 = vadd.f32 %v1579_v58, %v1578_v56 }
 0x2b3   : > { %v1588_v61 = vrot.slane %v1587_v59, 2 }
 0x2b4   : > { %v1581_v62 = vrot.slane %v1580_v60, 2 }
 0x2b5   : > { %v1589_v63 = vadd.f32 %v1588_v61, %v1587_v59 }
 0x2b6   : > { %v1582_v1 = vadd.f32 %v1581_v62, %v1580_v60 }
 0x2b7   : > { %v1590_v2 = vrot.slane %v1589_v63, 1 }
 0x2b8   : > { %v1583_v3 = vrot.slane %v1582_v1, 1 }
 0x2b9   : > { %v1591_v4 = vadd.f32 %v1590_v2, %v1589_v63 }
 0x2ba   : > { %v1584_v5 = vadd.f32 %v1583_v3, %v1582_v1 }
 0x2bb   : > { %v1648_v6 = vmul.f32 %v2715_v19, %v1591_v4 }
 0x2bc   : > { %v1647_v8 = vmul.f32 %v2715_v19, %v1584_v5  ;;  %v2109_v9 = vpop.f32.mrb[36].mxu1 }
 0x2bd   : > { %v1692_v10 = vrot.slane %v1648_v6, 7  ;;  %v1452_v7 = vadd.f32 %v2109_v9, %v2701_v41  ;;  %v1443_v11 = vpop.f32.mrb[37].mxu1 }
 0x2be   : > { %v1444_v12 = vadd.f32 %v2701_v41, %v1443_v11  ;;  %v2110_v13 = vpop.f32.mrb[38].mxu1 }
 0x2bf   : > { %v1455_v14 = vadd.f32 %v2110_v13, %v2701_v41  ;;  %v1446_v15 = vpop.f32.mrb[39].mxu1  ;;  %v1693_v16 = vsel %vm1672_vm5, %v1692_v10, %v1647_v8  ;;  %v1512_v18 = vmax.f32 %v1452_v7, 0.0 }
 0x2c0   : > { %v1447_v17 = vadd.f32 %v2701_v41, %v1446_v15  ;;  %v1510_v0 = vmax.f32 %v1444_v12, 0.0 }
 0x2c1   : > { %v1513_v20 = vmax.f32 %v1455_v14, 0.0 }
 0x2c2   : > { %v1511_v22 = vmax.f32 %v1447_v17, 0.0 }
 0x2c3   : > { %v1599_v24 = vadd.f32 %v1513_v20, %v1512_v18 }
 0x2c4   : > { %v1592_v25 = vadd.f32 %v1511_v22, %v1510_v0 }
 0x2c5   : > { %v1600_v26 = vrot.slane %v1599_v24, 4 }
 0x2c6   : > { %v1593_v27 = vrot.slane %v1592_v25, 4 }
 0x2c7   : > { %v1601_v28 = vadd.f32 %v1600_v26, %v1599_v24 }
 0x2c8   : > { %v1594_v37 = vadd.f32 %v1593_v27, %v1592_v25 }
 0x2c9   : > { %v1602_v29 = vrot.slane %v1601_v28, 2 }
 0x2ca   : > { %v1595_v40 = vrot.slane %v1594_v37, 2 }
 0x2cb   : > { %v1603_v30 = vadd.f32 %v1602_v29, %v1601_v28 }
 0x2cc   : > { %v1596_v31 = vadd.f32 %v1595_v40, %v1594_v37 }
 0x2cd   : > { %v1604_v21 = vrot.slane %v1603_v30, 1 }
 0x2ce   : > { %v1597_v32 = vrot.slane %v1596_v31, 1 }
 0x2cf   : > { %v1605_v33 = vadd.f32 %v1604_v21, %v1603_v30 }
 0x2d0   : > { %v1598_v34 = vadd.f32 %v1597_v32, %v1596_v31 }
 0x2d1   : > { %v1650_v35 = vmul.f32 %v2715_v19, %v1605_v33 }
 0x2d2   : > { %v1649_v36 = vmul.f32 %v2715_v19, %v1598_v34 }
 0x2d3   : > { %v1696_v42 = vrot.slane %v1650_v35, 5 }
 0x2d4   : > { %v1694_v38 = vrot.slane %v1649_v36, 6  ;;  %v2113_v39 = vpop.f32.mrb[40].mxu1 }
 0x2d5   : > { %v1468_v43 = vadd.f32 %v2113_v39, %v2701_v41  ;;  %v1459_v44 = vpop.f32.mrb[41].mxu1 }
 0x2d6   : > { %v1460_v45 = vadd.f32 %v2701_v41, %v1459_v44  ;;  %v2114_v23 = vpop.f32.mrb[42].mxu1  ;;  %v1695_v46 = vsel %vm1675_vm4, %v1694_v38, %v1693_v16 }
 0x2d7   : > { %v1471_v47 = vadd.f32 %v2114_v23, %v2701_v41  ;;  %v1462_v48 = vpop.f32.mrb[43].mxu1  ;;  %v1697_v49 = vsel %vm1678_vm10, %v1696_v42, %v1695_v46  ;;  %v1516_v51 = vmax.f32 %v1468_v43, 0.0 }
 0x2d8   : > { %v1463_v50 = vadd.f32 %v2701_v41, %v1462_v48  ;;  %v1514_v53 = vmax.f32 %v1460_v45, 0.0  ;;  %v1712_v45 = vld [vmem:[%s272_s18] sm:$0xff]  ;;  %v1713_v48 = vld [vmem:[%s272_s18 + $0x8] sm:$0xff] }
 0x2d9   : > { %v1517_v52 = vmax.f32 %v1471_v47, 0.0 }
 0x2da   : > { %v1515_v54 = vmax.f32 %v1463_v50, 0.0 }
 0x2db   : > { %v1613_v55 = vadd.f32 %v1517_v52, %v1516_v51 }
 0x2dc   : > { %v1606_v56 = vadd.f32 %v1515_v54, %v1514_v53 }
 0x2dd   : > { %v1614_v57 = vrot.slane %v1613_v55, 4 }
 0x2de   : > { %v1607_v58 = vrot.slane %v1606_v56, 4 }
 0x2df   : > { %v1615_v59 = vadd.f32 %v1614_v57, %v1613_v55 }
 0x2e0   : > { %v1608_v60 = vadd.f32 %v1607_v58, %v1606_v56 }
 0x2e1   : > { %v1616_v61 = vrot.slane %v1615_v59, 2 }
 0x2e2   : > { %v1609_v62 = vrot.slane %v1608_v60, 2 }
 0x2e3   : > { %v1617_v63 = vadd.f32 %v1616_v61, %v1615_v59 }
 0x2e4   : > { %v1610_v1 = vadd.f32 %v1609_v62, %v1608_v60 }
 0x2e5   : > { %v1618_v2 = vrot.slane %v1617_v63, 1 }
 0x2e6   : > { %v1611_v3 = vrot.slane %v1610_v1, 1 }
 0x2e7   : > { %v1619_v4 = vadd.f32 %v1618_v2, %v1617_v63 }
 0x2e8   : > { %v1612_v5 = vadd.f32 %v1611_v3, %v1610_v1 }
 0x2e9   : > { %v1652_v6 = vmul.f32 %v2715_v19, %v1619_v4 }
 0x2ea   : > { %v1651_v8 = vmul.f32 %v2715_v19, %v1612_v5 }
 0x2eb   : > { %v1700_v12 = vrot.slane %v1652_v6, 3 }
 0x2ec   : > { %v1698_v9 = vrot.slane %v1651_v8, 4  ;;  %v2117_v10 = vpop.f32.mrb[44].mxu1 }
 0x2ed   : > { %v1484_v7 = vadd.f32 %v2117_v10, %v2701_v41  ;;  %v1475_v11 = vpop.f32.mrb[45].mxu1 }
 0x2ee   : > { %v1476_v13 = vadd.f32 %v2701_v41, %v1475_v11  ;;  %v2118_v14 = vpop.f32.mrb[46].mxu1  ;;  %v1699_v15 = vsel %vm1681_vm11, %v1698_v9, %v1697_v49 }
 0x2ef   : > { %v1487_v16 = vadd.f32 %v2118_v14, %v2701_v41  ;;  %v1478_v17 = vpop.f32.mrb[47].mxu1  ;;  %v1701_v18 = vsel %vm1684_vm12, %v1700_v12, %v1699_v15  ;;  %v1520_v0 = vmax.f32 %v1484_v7, 0.0 }
 0x2f0   : > { %v1479_v20 = vadd.f32 %v2701_v41, %v1478_v17  ;;  %v1518_v24 = vmax.f32 %v1476_v13, 0.0 }
 0x2f1   : > { %v1521_v22 = vmax.f32 %v1487_v16, 0.0 }
 0x2f2   : > { %v1519_v25 = vmax.f32 %v1479_v20, 0.0 }
 0x2f3   : > { %v1627_v26 = vadd.f32 %v1521_v22, %v1520_v0 }
 0x2f4   : > { %v1620_v27 = vadd.f32 %v1519_v25, %v1518_v24 }
 0x2f5   : > { %v1628_v28 = vrot.slane %v1627_v26, 4 }
 0x2f6   : > { %v1621_v37 = vrot.slane %v1620_v27, 4 }
 0x2f7   : > { %v1629_v29 = vadd.f32 %v1628_v28, %v1627_v26 }
 0x2f8   : > { %v1622_v40 = vadd.f32 %v1621_v37, %v1620_v27 }
 0x2f9   : > { %v1630_v30 = vrot.slane %v1629_v29, 2 }
 0x2fa   : > { %v1623_v31 = vrot.slane %v1622_v40, 2 }
 0x2fb   : > { %v1631_v21 = vadd.f32 %v1630_v30, %v1629_v29 }
 0x2fc   : > { %v1624_v32 = vadd.f32 %v1623_v31, %v1622_v40 }
 0x2fd   : > { %v1632_v33 = vrot.slane %v1631_v21, 1 }
 0x2fe   : > { %v1625_v34 = vrot.slane %v1624_v32, 1 }
 0x2ff   : > { %v1633_v35 = vadd.f32 %v1632_v33, %v1631_v21 }
 0x300   : > { %v1626_v41 = vadd.f32 %v1625_v34, %v1624_v32 }
 0x301   : > { %v1654_v36 = vmul.f32 %v2715_v19, %v1633_v35 }
 0x302   : > { %v1653_v38 = vmul.f32 %v2715_v19, %v1626_v41  ;;  %v1932_v19 = vld [vmem:[%s2832_s5 + $0x3] ss:$0 sm:$0xff] }
 0x303   : > { %v1704_v42 = vrot.slane %v1654_v36, 1 }
 0x304   : > { %v1702_v39 = vrot.slane %v1653_v38, 2 }
 0x306   : > { %v1703_v43 = vsel %vm1687_vm13, %v1702_v39, %v1701_v18 }
 0x307   : > { %v1705_v44 = vsel %vm1690_vm14, %v1704_v42, %v1703_v43 }
 0x308   : > { %1710 = vadd.xlane.f32.xlu1 %v1705_v44 }
 0x334   : > { %v1709_v23 = vpop.xlane.xlu0 %1708 }
 0x335   : > { %v1714_v46 = vmul.f32 %v1712_v45, %v1709_v23 }
 0x337   : > { %v1721_v47 = vadd.f32 %v1932_v19, %v1714_v46 }
 0x339   : > { %1723 = vst [vmem:[%s261_s29] sm:$0xff] %v1721_v47 }
 0x395   : > { %v1711_v49 = vpop.xlane.xlu1 %1710 }
 0x396   : > { %v1715_v50 = vmul.f32 %v1713_v48, %v1711_v49 }
 0x398   : > { %v1722_v51 = vadd.f32 %v1932_v19, %v1715_v50 }
 0x39a   : > { %1724 = vst [vmem:[%s261_s29 + $0x8] sm:$0xff] %v1722_v51 }
 0x39b   : > { %2243 = shalt.err (!%p2240_p4)
}
 0x39c   : > { %s2244_s18 = scalar_lea.hbm %s2784_s13, 256  ;;  %s2248_s26 = scalar_lea.hbm %s2833_s6, 512 }
 0x39d   : > { %p2245_p7 = scmp.ne.s32.totalorder %s2784_s13, %s2244_s18  ;;  %p2249_p10 = scmp.lt.u32.totalorder %s2784_s13, %s2833_s6 }
 0x39e   : > { %p2250_p11 = scmp.lt.u32.totalorder %s2248_s26, %s2244_s18  ;;  %p2252_p13 = scmp.lt.u32.totalorder %s2244_s18, %s2784_s13 }
 0x39f   : > { %p2246_p8 = pnand %p2245_p7, %p2373_p5 }
 0x3a0   : > { %p2251_p12 = por %p2250_p11, %p2249_p10 }
 0x3a1   : > { %p2247_p9 = pneg %p2246_p8 }
 0x3a2   : > { %p2253_p0 = por %p2252_p13, %p2251_p12 }
 0x3a4   : > { %p2254_p1 = pnand %p2253_p0, %p2247_p9 }
 0x3a6   : > { %2257 = shalt.err (!%p2254_p1)
}
 0x3a7   : > { %s2298_s10 = smov 128   ;;  %s2299_s11 = smov 8  }
 0x3a8   : > { %2155 = dma.vmem_to_hbm [thread:$0]  (%p2373_p5), %s2779_s9, 256, %s2784_s13, %s2786_s14, %s2298_s10, %s2298_s10, %s2299_s11  }
 0x3a9 PF: > { %p2161_p2 = scmp.ge.s32.totalorder %s2292_s24, 2  ;;  %s1754_s12 = sand.u32 1, %s2280_s21  }
 0x3aa   : > { %s1755_s15 = scalar_lea.sflag [#allocation3], %s1754_s12 }
 0x3ab   : > { %p2158_p3 = pnand %p2161_p2, %p2377_p6 }
 0x3ad   : > { %2275 = dma.done.wait (!%p2158_p3), %s1755_s15, 256  }
 0x3ae   : > { %2277 = vsyncadd (!%p2158_p3), %s1755_s15, 4294967040  ;;  %p16_p4 = scmp.ge.s32.totalorder %s2360_s27, 4   ;;  %s2836_s21 = smov %s2284_s22 }
 0x3af   : > { %s2837_s22 = smov %s2288_s23  ;;  %s2838_s23 = smov %s2371_s30 }
 0x3b0   : > { %s2839_s24 = smov %s2360_s27  ;;  %18 = sbr.rel (!%p16_p4) target bundleno = 3 (0x3), region = 82 }
 0x3b7   :  { %1760 = vsyncpa [#allocation3], 1 }
 0x3b8   :  { %1762 = vsyncpa [#allocation3 + $0x1], 1 }

</bundles_post_ra>
